<compile_context>
chip_gen: v6e
topology: v6e:2x2x1
jax: 0.10.0
libtpu: 0.0.40
codegen_flags: <defaults>
</compile_context>

<pallas_src>
import functools

import jax
import jax.numpy as jnp
from jax.experimental import pallas as pl
from jax.experimental.pallas import tpu as pltpu


def _row_tile(n, target=512):
    """Row tile that divides n; prefer multiples of 8 up to `target`."""
    if n <= target:
        return n
    best = 0
    for tm in range(8, target + 1, 8):
        if n % tm == 0:
            best = tm
    return best if best else n


# ----------------------------- Pallas kernels ------------------------------

def embln_proj_kernel(x_ref, g_ref, b_ref, wih_ref, bias_ref, gx_ref):
    """Fused: LayerNorm(E) + input projection for BOTH LSTM directions.

    x:    (tm, E)      time-major rows of the embedded sequence
    g/b:  (1, E)       LN gamma / beta
    wih:  (2, E, 4H)   pre-transposed W_ih per direction (gate order i,f,g,o)
    bias: (2, 1, 4H)   precomputed b_ih + b_hh per direction
    gx:   (2, tm, 4H)  LN(x) @ W_ih + bias   (hoisted out of the recurrence)
    """
    x = x_ref[...]
    mean = jnp.mean(x, axis=-1, keepdims=True)
    var = jnp.mean((x - mean) ** 2, axis=-1, keepdims=True)
    xn = (x - mean) * jax.lax.rsqrt(var + 1e-5) * g_ref[...] + b_ref[...]
    gx_ref[0] = (jnp.dot(xn, wih_ref[0], preferred_element_type=jnp.float32)
                 + bias_ref[0])
    gx_ref[1] = (jnp.dot(xn, wih_ref[1], preferred_element_type=jnp.float32)
                 + bias_ref[1])


def bilstm_kernel(gx_ref, whh_ref, out_ref, h_scratch, c_scratch):
    """One LSTM direction; grid=(2,) over directions (0 fwd, 1 bwd).

    gx:   (1, T, B, 4H)  precomputed x@W_ih + bias for this direction
    whh:  (1, H, 4H)     pre-transposed W_hh (resident in VMEM for the loop)
    out:  (1, T, B, H)   hidden states; whole direction slab, one DMA writeback
    h/c scratch: (B, H)
    """
    d = pl.program_id(0)
    T = gx_ref.shape[1]
    H = whh_ref.shape[1]

    h_scratch[...] = jnp.zeros_like(h_scratch)
    c_scratch[...] = jnp.zeros_like(c_scratch)
    whh = whh_ref[0]                      # (H, 4H), loaded once

    def step(i, carry):
        # forward (d=0): t = i ; backward (d=1): t = T-1-i
        t = i + d * (T - 1 - 2 * i)
        gates = gx_ref[0, t] + jnp.dot(h_scratch[...], whh,
                                       preferred_element_type=jnp.float32)
        # NOTE: with H=32 these are sub-vreg lane slices of a 128-lane gate
        # slab; pad H to 128 (or batch up B) for full lane alignment at scale.
        i_g = jax.nn.sigmoid(gates[:, 0:H])
        f_g = jax.nn.sigmoid(gates[:, H:2 * H])
        g_g = jnp.tanh(gates[:, 2 * H:3 * H])
        o_g = jax.nn.sigmoid(gates[:, 3 * H:4 * H])
        c_new = f_g * c_scratch[...] + i_g * g_g
        h_new = o_g * jnp.tanh(c_new)
        h_scratch[...] = h_new
        c_scratch[...] = c_new
        out_ref[0, t] = h_new
        return carry

    jax.lax.fori_loop(0, T, step, 0, unroll=(T <= 32))


def separator_kernel(f_ref, b_ref, g_ref, beta_ref, w_ref, wb_ref, o_ref):
    """LayerNorm(2H) -> (Dropout == identity in eval) -> Linear(2H, O_pad).

    f/b:  (1, tm, H)   forward / backward hidden rows (concatenated in VMEM)
    g/beta: (1, 2H)    LN gamma / beta
    w:    (2H, O_pad)  pre-transposed, zero-padded classifier weight
    wb:   (1, O_pad)
    out:  (tm, O_pad)  lane-dense (padded) logits
    """
    x = jnp.concatenate([f_ref[0], b_ref[0]], axis=-1)      # (tm, 2H)
    mean = jnp.mean(x, axis=-1, keepdims=True)
    var = jnp.mean((x - mean) ** 2, axis=-1, keepdims=True)
    xn = (x - mean) * jax.lax.rsqrt(var + 1e-5) * g_ref[...] + beta_ref[...]
    o_ref[...] = (jnp.dot(xn, w_ref[...], preferred_element_type=jnp.float32)
                  + wb_ref[...])


# ------------------------------- Wrapper ------------------------------------

def seq_tagger_forward(tokens, params):
    """tokens: (B, T) int32 -> logits (B, O, T) float32."""
    emb_table = params["embeddings"]            # (V, E)
    E = emb_table.shape[1]
    B, T = tokens.shape
    H = params["w_hh"].shape[-1]
    O = params["sep_w"].shape[0]
    N = T * B
    G4 = 4 * H
    O_pad = ((O + 127) // 128) * 128

    # One-time layout plumbing (constant-folded under jit since params are
    # closure constants): pre-transpose weights, pre-sum the LSTM biases,
    # pad the classifier to a lane-dense output width.
    w_ih_t = jnp.swapaxes(params["w_ih"], 1, 2)              # (2, E, 4H)
    w_hh_t = jnp.swapaxes(params["w_hh"], 1, 2)              # (2, H, 4H)
    lstm_bias = params["b_ih"] + params["b_hh"]              # (2, 1, 4H)
    w_sep_t = jnp.pad(params["sep_w"].T, ((0, 0), (0, O_pad - O)))   # (2H, O_pad)
    b_sep = jnp.pad(params["sep_b"], ((0, 0), (0, O_pad - O)))       # (1, O_pad)

    # Embedding gather directly in time-major (T, B, E); no full-tensor
    # HBM transpose later (PyTorch .permute(1, 0, 2) equivalent).
    emb = jnp.take(emb_table, tokens.T, axis=0).astype(jnp.float32)  # (T, B, E)
    emb = emb.reshape(N, E)

    tm = _row_tile(N)

    # Fused embedding-LN + x @ W_ih (+ bias) for both directions.
    gates_x = pl.pallas_call(
        embln_proj_kernel,
        out_shape=jax.ShapeDtypeStruct((2, N, G4), jnp.float32),
        grid=(N // tm,),
        in_specs=[
            pl.BlockSpec((tm, E), lambda i: (i, 0)),
            pl.BlockSpec((1, E), lambda i: (0, 0)),
            pl.BlockSpec((1, E), lambda i: (0, 0)),
            pl.BlockSpec((2, E, G4), lambda i: (0, 0, 0)),
            pl.BlockSpec((2, 1, G4), lambda i: (0, 0, 0)),
        ],
        out_specs=pl.BlockSpec((2, tm, G4), lambda i: (0, i, 0)),
        compiler_params=pltpu.CompilerParams(
            dimension_semantics=("parallel",)),
    )(emb, params["emb_ln_g"], params["emb_ln_b"], w_ih_t, lstm_bias)

    gates_x = gates_x.reshape(2, T, B, G4)                   # free reshape

    # Recurrence only: h @ W_hh per step, time loop inside the kernel,
    # fwd/bwd directions sharded across TensorCores on v7x.
    hidden = pl.pallas_call(
        bilstm_kernel,
        out_shape=jax.ShapeDtypeStruct((2, T, B, H), jnp.float32),
        grid_spec=pltpu.PrefetchScalarGridSpec(
            num_scalar_prefetch=0,
            grid=(2,),
            in_specs=[
                pl.BlockSpec((1, T, B, G4), lambda d: (d, 0, 0, 0)),
                pl.BlockSpec((1, H, G4), lambda d: (d, 0, 0)),
            ],
            out_specs=pl.BlockSpec((1, T, B, H), lambda d: (d, 0, 0, 0)),
            scratch_shapes=[
                pltpu.VMEM((B, H), jnp.float32),
                pltpu.VMEM((B, H), jnp.float32),
            ],
        ),
        compiler_params=pltpu.CompilerParams(
            dimension_semantics=("parallel",)),
    )(gates_x, w_hh_t)

    hidden = hidden.reshape(2, N, H)                         # free reshape

    # Separator: LN(2H) + Linear(2H, O).  fwd/bwd concat happens in VMEM;
    # output padded to 128 lanes for unmasked stores.
    logits = pl.pallas_call(
        separator_kernel,
        out_shape=jax.ShapeDtypeStruct((N, O_pad), jnp.float32),
        grid=(N // tm,),
        in_specs=[
            pl.BlockSpec((1, tm, H), lambda i: (0, i, 0)),
            pl.BlockSpec((1, tm, H), lambda i: (1, i, 0)),
            pl.BlockSpec((1, 2 * H), lambda i: (0, 0)),
            pl.BlockSpec((1, 2 * H), lambda i: (0, 0)),
            pl.BlockSpec((2 * H, O_pad), lambda i: (0, 0)),
            pl.BlockSpec((1, O_pad), lambda i: (0, 0)),
        ],
        out_specs=pl.BlockSpec((tm, O_pad), lambda i: (i, 0)),
        compiler_params=pltpu.CompilerParams(
            dimension_semantics=("parallel",)),
    )(hidden, hidden, params["sep_ln_g"], params["sep_ln_b"], w_sep_t, b_sep)

    # (T*B, O_pad) -> (T, B, O) -> (B, O, T)   (PyTorch .permute(1, 2, 0))
    return logits.reshape(T, B, O_pad)[:, :, :O].transpose(1, 2, 0)


# ------------------------- Pure-JAX reference (check) -----------------------

def _ref_lstm_dir(x_tbe, wih, whh, bias):
    B = x_tbe.shape[1]
    H = whh.shape[-1]

    def step(carry, x_t):
        h, c = carry
        gates = x_t @ wih.T + h @ whh.T + bias
        i = jax.nn.sigmoid(gates[:, 0:H])
        f = jax.nn.sigmoid(gates[:, H:2 * H])
        g = jnp.tanh(gates[:, 2 * H:3 * H])
        o = jax.nn.sigmoid(gates[:, 3 * H:4 * H])
        c = f * c + i * g
        h = o * jnp.tanh(c)
        return (h, c), h

    init = (jnp.zeros((B, H), jnp.float32), jnp.zeros((B, H), jnp.float32))
    _, hs = jax.lax.scan(step, init, x_tbe)
    return hs


def seq_tagger_reference(tokens, params):
    emb = jnp.take(params["embeddings"], tokens, axis=0).astype(jnp.float32)

    def ln(x, g, b):
        m = jnp.mean(x, axis=-1, keepdims=True)
        v = jnp.mean((x - m) ** 2, axis=-1, keepdims=True)
        return (x - m) * jax.lax.rsqrt(v + 1e-5) * g + b

    x = ln(emb, params["emb_ln_g"][0], params["emb_ln_b"][0])
    x = x.transpose(1, 0, 2)                    # (T, B, E)
    bias_f = params["b_ih"][0, 0] + params["b_hh"][0, 0]
    bias_b = params["b_ih"][1, 0] + params["b_hh"][1, 0]
    h_f = _ref_lstm_dir(x, params["w_ih"][0], params["w_hh"][0], bias_f)
    h_b = _ref_lstm_dir(x[::-1], params["w_ih"][1], params["w_hh"][1], bias_b)[::-1]
    res = jnp.concatenate([h_f, h_b], axis=-1)  # (T, B, 2H)
    res = ln(res, params["sep_ln_g"][0], params["sep_ln_b"][0])
    logits = res @ params["sep_w"].T + params["sep_b"][0]
    return logits.transpose(1, 2, 0)            # (B, O, T)


# --------------------------------- Main --------------------------------------

def make_params(key, vocab, E, H, O, pad_id=0):
    ks = jax.random.split(key, 8)
    bound = 1.0 / jnp.sqrt(H)
    emb = jax.random.normal(ks[0], (vocab, E), jnp.float32) * 0.1
    emb = emb.at[pad_id].set(0.0)               # padding row (frozen-zero style)
    params = {
        "embeddings": emb,
        "emb_ln_g": jnp.ones((1, E), jnp.float32),
        "emb_ln_b": jnp.zeros((1, E), jnp.float32),
        # Stacked fwd/bwd LSTM weights, PyTorch gate order (i, f, g, o).
        "w_ih": jax.random.uniform(ks[1], (2, 4 * H, E), jnp.float32, -bound, bound),
        "w_hh": jax.random.uniform(ks[2], (2, 4 * H, H), jnp.float32, -bound, bound),
        "b_ih": jax.random.uniform(ks[3], (2, 1, 4 * H), jnp.float32, -bound, bound),
        "b_hh": jax.random.uniform(ks[4], (2, 1, 4 * H), jnp.float32, -bound, bound),
        "sep_ln_g": jnp.ones((1, 2 * H), jnp.float32),
        "sep_ln_b": jnp.zeros((1, 2 * H), jnp.float32),
        "sep_w": jax.random.uniform(ks[5], (O, 2 * H), jnp.float32, -bound, bound),
        "sep_b": jax.random.uniform(ks[6], (1, O), jnp.float32, -bound, bound),
    }
    return params


if __name__ == "__main__":
    B, T = 2, 8                 # batch, sequence length
    VOCAB, E, H, O = 50, 32, 32, 9
    PAD_ID = 0

    key = jax.random.PRNGKey(0)
    kp, kx = jax.random.split(key)
    params = make_params(kp, VOCAB, E, H, O, pad_id=PAD_ID)
    tokens = jax.random.randint(kx, (B, T), 0, VOCAB, dtype=jnp.int32)

    fwd = jax.jit(functools.partial(seq_tagger_forward, params=params))
    out = jax.block_until_ready(fwd(tokens))
    assert out.shape == (B, O, T), out.shape

    ref = seq_tagger_reference(tokens, params)
    assert jnp.allclose(out, ref, atol=1e-4, rtol=1e-4), float(
        jnp.max(jnp.abs(out - ref)))

    print("KERNEL_OK")
</pallas_src>

<mosaic_0001>
module attributes {stable_mosaic.version = 11 : i64} {
  func.func @embln_proj_kernel(%arg0: i32, %arg1: memref<16x32xf32, #tpu.memory_space<vmem>>, %arg2: memref<1x32xf32, #tpu.memory_space<vmem>>, %arg3: memref<1x32xf32, #tpu.memory_space<vmem>>, %arg4: memref<2x32x128xf32, #tpu.memory_space<vmem>>, %arg5: memref<2x1x128xf32, #tpu.memory_space<vmem>>, %arg6: memref<2x16x128xf32, #tpu.memory_space<vmem>>) attributes {dimension_semantics = [#tpu.dimension_semantics<parallel>], iteration_bounds = array<i64: 1>, scalar_prefetch = 0 : i64, scratch_operands = 0 : i64, tpu.core_type = #tpu.core_type<tc>, window_params = [{transform_indices = @transform_0, window_bounds = array<i64: 16, 32>}, {pipeline_mode = #tpu.pipeline_mode<synchronous>, transform_indices = @transform_1, window_bounds = array<i64: 1, 32>}, {pipeline_mode = #tpu.pipeline_mode<synchronous>, transform_indices = @transform_2, window_bounds = array<i64: 1, 32>}, {pipeline_mode = #tpu.pipeline_mode<synchronous>, transform_indices = @transform_3, window_bounds = array<i64: 2, 32, 128>}, {pipeline_mode = #tpu.pipeline_mode<synchronous>, transform_indices = @transform_4, window_bounds = array<i64: 2, 1, 128>}, {transform_indices = @transform_5, window_bounds = array<i64: 2, 16, 128>}]} {
    %c0 = arith.constant 0 : index
    %c0_0 = arith.constant 0 : index
    %0 = vector.load %arg1[%c0, %c0_0] : memref<16x32xf32, #tpu.memory_space<vmem>>, vector<16x32xf32>
    %cst = arith.constant dense<0.000000e+00> : vector<16xf32>
    %1 = vector.multi_reduction <add>, %0, %cst [1] : vector<16x32xf32> to vector<16xf32>
    %2 = vector.shape_cast %1 : vector<16xf32> to vector<16x1xf32>
    %cst_1 = arith.constant 3.200000e+01 : f32
    %3 = vector.broadcast %cst_1 : f32 to vector<16x1xf32>
    %4 = arith.divf %2, %3 : vector<16x1xf32>
    %5 = vector.broadcast %4 : vector<16x1xf32> to vector<16x32xf32>
    %6 = arith.subf %0, %5 : vector<16x32xf32>
    %7 = arith.mulf %6, %6 : vector<16x32xf32>
    %cst_2 = arith.constant dense<0.000000e+00> : vector<16xf32>
    %8 = vector.multi_reduction <add>, %7, %cst_2 [1] : vector<16x32xf32> to vector<16xf32>
    %9 = vector.shape_cast %8 : vector<16xf32> to vector<16x1xf32>
    %cst_3 = arith.constant 3.200000e+01 : f32
    %10 = vector.broadcast %cst_3 : f32 to vector<16x1xf32>
    %11 = arith.divf %9, %10 : vector<16x1xf32>
    %12 = vector.broadcast %4 : vector<16x1xf32> to vector<16x32xf32>
    %13 = arith.subf %0, %12 : vector<16x32xf32>
    %cst_4 = arith.constant 9.99999974E-6 : f32
    %14 = vector.broadcast %cst_4 : f32 to vector<16x1xf32>
    %15 = arith.addf %11, %14 : vector<16x1xf32>
    %16 = math.rsqrt %15 : vector<16x1xf32>
    %17 = vector.broadcast %16 : vector<16x1xf32> to vector<16x32xf32>
    %18 = arith.mulf %13, %17 : vector<16x32xf32>
    %c0_5 = arith.constant 0 : index
    %c0_6 = arith.constant 0 : index
    %19 = vector.load %arg2[%c0_5, %c0_6] : memref<1x32xf32, #tpu.memory_space<vmem>>, vector<1x32xf32>
    %20 = vector.broadcast %19 : vector<1x32xf32> to vector<16x32xf32>
    %21 = arith.mulf %18, %20 : vector<16x32xf32>
    %c0_7 = arith.constant 0 : index
    %c0_8 = arith.constant 0 : index
    %22 = vector.load %arg3[%c0_7, %c0_8] : memref<1x32xf32, #tpu.memory_space<vmem>>, vector<1x32xf32>
    %23 = vector.broadcast %22 : vector<1x32xf32> to vector<16x32xf32>
    %24 = arith.addf %21, %23 : vector<16x32xf32>
    %c0_9 = arith.constant 0 : index
    %c0_10 = arith.constant 0 : index
    %c0_11 = arith.constant 0 : index
    %25 = vector.load %arg4[%c0_9, %c0_10, %c0_11] : memref<2x32x128xf32, #tpu.memory_space<vmem>>, vector<1x32x128xf32>
    %26 = vector.shape_cast %25 : vector<1x32x128xf32> to vector<32x128xf32>
    %cst_12 = arith.constant dense<0.000000e+00> : vector<16x128xf32>
    %27 = tpu.matmul %24, %26, %cst_12 {dimension_numbers = #tpu.dot_dimension_numbers<[1], [0], [0], [1], [0, 0, 1, 1], [], []>} : vector<16x32xf32>, vector<32x128xf32>, vector<16x128xf32> -> vector<16x128xf32>
    %c0_13 = arith.constant 0 : index
    %c0_14 = arith.constant 0 : index
    %c0_15 = arith.constant 0 : index
    %28 = vector.load %arg5[%c0_13, %c0_14, %c0_15] : memref<2x1x128xf32, #tpu.memory_space<vmem>>, vector<1x1x128xf32>
    %29 = vector.shape_cast %28 : vector<1x1x128xf32> to vector<1x128xf32>
    %30 = vector.broadcast %29 : vector<1x128xf32> to vector<16x128xf32>
    %31 = arith.addf %27, %30 : vector<16x128xf32>
    %c0_16 = arith.constant 0 : index
    %c0_17 = arith.constant 0 : index
    %c0_18 = arith.constant 0 : index
    %32 = vector.load %arg6[%c0_16, %c0_17, %c0_18] : memref<2x16x128xf32, #tpu.memory_space<vmem>>, vector<1x16x128xf32>
    %33 = vector.shape_cast %32 : vector<1x16x128xf32> to vector<16x128xf32>
    %34 = vector.shape_cast %31 : vector<16x128xf32> to vector<1x16x128xf32>
    tpu.vector_store %arg6[%c0_16, %c0_17, %c0_18], %34 {strides = array<i32>} : memref<2x16x128xf32, #tpu.memory_space<vmem>>, vector<1x16x128xf32>,
    %c1 = arith.constant 1 : index
    %c0_19 = arith.constant 0 : index
    %c0_20 = arith.constant 0 : index
    %35 = vector.load %arg4[%c1, %c0_19, %c0_20] : memref<2x32x128xf32, #tpu.memory_space<vmem>>, vector<1x32x128xf32>
    %36 = vector.shape_cast %35 : vector<1x32x128xf32> to vector<32x128xf32>
    %cst_21 = arith.constant dense<0.000000e+00> : vector<16x128xf32>
    %37 = tpu.matmul %24, %36, %cst_21 {dimension_numbers = #tpu.dot_dimension_numbers<[1], [0], [0], [1], [0, 0, 1, 1], [], []>} : vector<16x32xf32>, vector<32x128xf32>, vector<16x128xf32> -> vector<16x128xf32>
    %c1_22 = arith.constant 1 : index
    %c0_23 = arith.constant 0 : index
    %c0_24 = arith.constant 0 : index
    %38 = vector.load %arg5[%c1_22, %c0_23, %c0_24] : memref<2x1x128xf32, #tpu.memory_space<vmem>>, vector<1x1x128xf32>
    %39 = vector.shape_cast %38 : vector<1x1x128xf32> to vector<1x128xf32>
    %40 = vector.broadcast %39 : vector<1x128xf32> to vector<16x128xf32>
    %41 = arith.addf %37, %40 : vector<16x128xf32>
    %c1_25 = arith.constant 1 : index
    %c0_26 = arith.constant 0 : index
    %c0_27 = arith.constant 0 : index
    %42 = vector.load %arg6[%c1_25, %c0_26, %c0_27] : memref<2x16x128xf32, #tpu.memory_space<vmem>>, vector<1x16x128xf32>
    %43 = vector.shape_cast %42 : vector<1x16x128xf32> to vector<16x128xf32>
    %44 = vector.shape_cast %41 : vector<16x128xf32> to vector<1x16x128xf32>
    tpu.vector_store %arg6[%c1_25, %c0_26, %c0_27], %44 {strides = array<i32>} : memref<2x16x128xf32, #tpu.memory_space<vmem>>, vector<1x16x128xf32>,
    return
  }
  func.func @transform_0(%arg0: i32) -> (i32, i32) {
    %c0_i32 = arith.constant 0 : i32
    %c0_i32_0 = arith.constant 0 : i32
    return %arg0, %c0_i32 : i32, i32
  }
  func.func @transform_1(%arg0: i32) -> (i32, i32) {
    %c0_i32 = arith.constant 0 : i32
    %c0_i32_0 = arith.constant 0 : i32
    %c0_i32_1 = arith.constant 0 : i32
    return %c0_i32, %c0_i32_0 : i32, i32
  }
  func.func @transform_2(%arg0: i32) -> (i32, i32) {
    %c0_i32 = arith.constant 0 : i32
    %c0_i32_0 = arith.constant 0 : i32
    %c0_i32_1 = arith.constant 0 : i32
    return %c0_i32, %c0_i32_0 : i32, i32
  }
  func.func @transform_3(%arg0: i32) -> (i32, i32, i32) {
    %c0_i32 = arith.constant 0 : i32
    %c0_i32_0 = arith.constant 0 : i32
    %c0_i32_1 = arith.constant 0 : i32
    %c0_i32_2 = arith.constant 0 : i32
    return %c0_i32, %c0_i32_0, %c0_i32_1 : i32, i32, i32
  }
  func.func @transform_4(%arg0: i32) -> (i32, i32, i32) {
    %c0_i32 = arith.constant 0 : i32
    %c0_i32_0 = arith.constant 0 : i32
    %c0_i32_1 = arith.constant 0 : i32
    %c0_i32_2 = arith.constant 0 : i32
    return %c0_i32, %c0_i32_0, %c0_i32_1 : i32, i32, i32
  }
  func.func @transform_5(%arg0: i32) -> (i32, i32, i32) {
    %c0_i32 = arith.constant 0 : i32
    %c0_i32_0 = arith.constant 0 : i32
    %c0_i32_1 = arith.constant 0 : i32
    return %c0_i32, %arg0, %c0_i32_0 : i32, i32, i32
  }
}

module attributes {stable_mosaic.version = 11 : i64} {
  func.func @separator_kernel(%arg0: i32, %arg1: memref<1x16x32xf32, #tpu.memory_space<vmem>>, %arg2: memref<1x16x32xf32, #tpu.memory_space<vmem>>, %arg3: memref<1x64xf32, #tpu.memory_space<vmem>>, %arg4: memref<1x64xf32, #tpu.memory_space<vmem>>, %arg5: memref<64x128xf32, #tpu.memory_space<vmem>>, %arg6: memref<1x128xf32, #tpu.memory_space<vmem>>, %arg7: memref<16x128xf32, #tpu.memory_space<vmem>>) attributes {dimension_semantics = [#tpu.dimension_semantics<parallel>], iteration_bounds = array<i64: 1>, scalar_prefetch = 0 : i64, scratch_operands = 0 : i64, tpu.core_type = #tpu.core_type<tc>, window_params = [{transform_indices = @transform_0, window_bounds = array<i64: 1, 16, 32>}, {transform_indices = @transform_1, window_bounds = array<i64: 1, 16, 32>}, {pipeline_mode = #tpu.pipeline_mode<synchronous>, transform_indices = @transform_2, window_bounds = array<i64: 1, 64>}, {pipeline_mode = #tpu.pipeline_mode<synchronous>, transform_indices = @transform_3, window_bounds = array<i64: 1, 64>}, {pipeline_mode = #tpu.pipeline_mode<synchronous>, transform_indices = @transform_4, window_bounds = array<i64: 64, 128>}, {pipeline_mode = #tpu.pipeline_mode<synchronous>, transform_indices = @transform_5, window_bounds = array<i64: 1, 128>}, {transform_indices = @transform_6, window_bounds = array<i64: 16, 128>}]} {
    %c0 = arith.constant 0 : index
    %c0_0 = arith.constant 0 : index
    %c0_1 = arith.constant 0 : index
    %0 = vector.load %arg1[%c0, %c0_0, %c0_1] : memref<1x16x32xf32, #tpu.memory_space<vmem>>, vector<1x16x32xf32>
    %1 = vector.shape_cast %0 : vector<1x16x32xf32> to vector<16x32xf32>
    %c0_2 = arith.constant 0 : index
    %c0_3 = arith.constant 0 : index
    %c0_4 = arith.constant 0 : index
    %2 = vector.load %arg2[%c0_2, %c0_3, %c0_4] : memref<1x16x32xf32, #tpu.memory_space<vmem>>, vector<1x16x32xf32>
    %3 = vector.shape_cast %2 : vector<1x16x32xf32> to vector<16x32xf32>
    %4 = tpu.concatenate %1, %3 in 1 : vector<16x32xf32>, vector<16x32xf32> -> vector<16x64xf32>
    %cst = arith.constant dense<0.000000e+00> : vector<16xf32>
    %5 = vector.multi_reduction <add>, %4, %cst [1] : vector<16x64xf32> to vector<16xf32>
    %6 = vector.shape_cast %5 : vector<16xf32> to vector<16x1xf32>
    %cst_5 = arith.constant 6.400000e+01 : f32
    %7 = vector.broadcast %cst_5 : f32 to vector<16x1xf32>
    %8 = arith.divf %6, %7 : vector<16x1xf32>
    %9 = vector.broadcast %8 : vector<16x1xf32> to vector<16x64xf32>
    %10 = arith.subf %4, %9 : vector<16x64xf32>
    %11 = arith.mulf %10, %10 : vector<16x64xf32>
    %cst_6 = arith.constant dense<0.000000e+00> : vector<16xf32>
    %12 = vector.multi_reduction <add>, %11, %cst_6 [1] : vector<16x64xf32> to vector<16xf32>
    %13 = vector.shape_cast %12 : vector<16xf32> to vector<16x1xf32>
    %cst_7 = arith.constant 6.400000e+01 : f32
    %14 = vector.broadcast %cst_7 : f32 to vector<16x1xf32>
    %15 = arith.divf %13, %14 : vector<16x1xf32>
    %16 = vector.broadcast %8 : vector<16x1xf32> to vector<16x64xf32>
    %17 = arith.subf %4, %16 : vector<16x64xf32>
    %cst_8 = arith.constant 9.99999974E-6 : f32
    %18 = vector.broadcast %cst_8 : f32 to vector<16x1xf32>
    %19 = arith.addf %15, %18 : vector<16x1xf32>
    %20 = math.rsqrt %19 : vector<16x1xf32>
    %21 = vector.broadcast %20 : vector<16x1xf32> to vector<16x64xf32>
    %22 = arith.mulf %17, %21 : vector<16x64xf32>
    %c0_9 = arith.constant 0 : index
    %c0_10 = arith.constant 0 : index
    %23 = vector.load %arg3[%c0_9, %c0_10] : memref<1x64xf32, #tpu.memory_space<vmem>>, vector<1x64xf32>
    %24 = vector.broadcast %23 : vector<1x64xf32> to vector<16x64xf32>
    %25 = arith.mulf %22, %24 : vector<16x64xf32>
    %c0_11 = arith.constant 0 : index
    %c0_12 = arith.constant 0 : index
    %26 = vector.load %arg4[%c0_11, %c0_12] : memref<1x64xf32, #tpu.memory_space<vmem>>, vector<1x64xf32>
    %27 = vector.broadcast %26 : vector<1x64xf32> to vector<16x64xf32>
    %28 = arith.addf %25, %27 : vector<16x64xf32>
    %c0_13 = arith.constant 0 : index
    %c0_14 = arith.constant 0 : index
    %29 = vector.load %arg5[%c0_13, %c0_14] : memref<64x128xf32, #tpu.memory_space<vmem>>, vector<64x128xf32>
    %cst_15 = arith.constant dense<0.000000e+00> : vector<16x128xf32>
    %30 = tpu.matmul %28, %29, %cst_15 {dimension_numbers = #tpu.dot_dimension_numbers<[1], [0], [0], [1], [0, 0, 1, 1], [], []>} : vector<16x64xf32>, vector<64x128xf32>, vector<16x128xf32> -> vector<16x128xf32>
    %c0_16 = arith.constant 0 : index
    %c0_17 = arith.constant 0 : index
    %31 = vector.load %arg6[%c0_16, %c0_17] : memref<1x128xf32, #tpu.memory_space<vmem>>, vector<1x128xf32>
    %32 = vector.broadcast %31 : vector<1x128xf32> to vector<16x128xf32>
    %33 = arith.addf %30, %32 : vector<16x128xf32>
    %c0_18 = arith.constant 0 : index
    %c0_19 = arith.constant 0 : index
    %34 = vector.load %arg7[%c0_18, %c0_19] : memref<16x128xf32, #tpu.memory_space<vmem>>, vector<16x128xf32>
    tpu.vector_store %arg7[%c0_18, %c0_19], %33 {strides = array<i32>} : memref<16x128xf32, #tpu.memory_space<vmem>>, vector<16x128xf32>,
    return
  }
  func.func @transform_0(%arg0: i32) -> (i32, i32, i32) {
    %c0_i32 = arith.constant 0 : i32
    %c0_i32_0 = arith.constant 0 : i32
    %c0_i32_1 = arith.constant 0 : i32
    return %c0_i32, %arg0, %c0_i32_0 : i32, i32, i32
  }
  func.func @transform_1(%arg0: i32) -> (i32, i32, i32) {
    %c1_i32 = arith.constant 1 : i32
    %c0_i32 = arith.constant 0 : i32
    %c0_i32_0 = arith.constant 0 : i32
    return %c1_i32, %arg0, %c0_i32 : i32, i32, i32
  }
  func.func @transform_2(%arg0: i32) -> (i32, i32) {
    %c0_i32 = arith.constant 0 : i32
    %c0_i32_0 = arith.constant 0 : i32
    %c0_i32_1 = arith.constant 0 : i32
    return %c0_i32, %c0_i32_0 : i32, i32
  }
  func.func @transform_3(%arg0: i32) -> (i32, i32) {
    %c0_i32 = arith.constant 0 : i32
    %c0_i32_0 = arith.constant 0 : i32
    %c0_i32_1 = arith.constant 0 : i32
    return %c0_i32, %c0_i32_0 : i32, i32
  }
  func.func @transform_4(%arg0: i32) -> (i32, i32) {
    %c0_i32 = arith.constant 0 : i32
    %c0_i32_0 = arith.constant 0 : i32
    %c0_i32_1 = arith.constant 0 : i32
    return %c0_i32, %c0_i32_0 : i32, i32
  }
  func.func @transform_5(%arg0: i32) -> (i32, i32) {
    %c0_i32 = arith.constant 0 : i32
    %c0_i32_0 = arith.constant 0 : i32
    %c0_i32_1 = arith.constant 0 : i32
    return %c0_i32, %c0_i32_0 : i32, i32
  }
  func.func @transform_6(%arg0: i32) -> (i32, i32) {
    %c0_i32 = arith.constant 0 : i32
    %c0_i32_0 = arith.constant 0 : i32
    return %arg0, %c0_i32 : i32, i32
  }
}

module attributes {stable_mosaic.version = 11 : i64} {
  func.func @bilstm_kernel(%arg0: i32, %arg1: memref<1x8x2x128xf32, #tpu.memory_space<vmem>>, %arg2: memref<1x32x128xf32, #tpu.memory_space<vmem>>, %arg3: memref<1x8x2x32xf32, #tpu.memory_space<vmem>>, %arg4: memref<2x32xf32, #tpu.memory_space<vmem>>, %arg5: memref<2x32xf32, #tpu.memory_space<vmem>>) attributes {dimension_semantics = [#tpu.dimension_semantics<parallel>], iteration_bounds = array<i64: 2>, scalar_prefetch = 0 : i64, scratch_operands = 2 : i64, tpu.core_type = #tpu.core_type<tc>, window_params = [{transform_indices = @transform_0, window_bounds = array<i64: 1, 8, 2, 128>}, {transform_indices = @transform_1, window_bounds = array<i64: 1, 32, 128>}, {transform_indices = @transform_2, window_bounds = array<i64: 1, 8, 2, 32>}]} {
    %cst = arith.constant 0.000000e+00 : f32
    %0 = vector.broadcast %cst : f32 to vector<2x32xf32>
    %c0 = arith.constant 0 : index
    %c0_0 = arith.constant 0 : index
    %1 = vector.load %arg4[%c0, %c0_0] : memref<2x32xf32, #tpu.memory_space<vmem>>, vector<2x32xf32>
    tpu.vector_store %arg4[%c0, %c0_0], %0 {strides = array<i32>} : memref<2x32xf32, #tpu.memory_space<vmem>>, vector<2x32xf32>,
    %cst_1 = arith.constant 0.000000e+00 : f32
    %2 = vector.broadcast %cst_1 : f32 to vector<2x32xf32>
    %c0_2 = arith.constant 0 : index
    %c0_3 = arith.constant 0 : index
    %3 = vector.load %arg5[%c0_2, %c0_3] : memref<2x32xf32, #tpu.memory_space<vmem>>, vector<2x32xf32>
    tpu.vector_store %arg5[%c0_2, %c0_3], %2 {strides = array<i32>} : memref<2x32xf32, #tpu.memory_space<vmem>>, vector<2x32xf32>,
    %c0_4 = arith.constant 0 : index
    %c0_5 = arith.constant 0 : index
    %c0_6 = arith.constant 0 : index
    %4 = vector.load %arg2[%c0_4, %c0_5, %c0_6] : memref<1x32x128xf32, #tpu.memory_space<vmem>>, vector<1x32x128xf32>
    %5 = vector.shape_cast %4 : vector<1x32x128xf32> to vector<32x128xf32>
    %c0_i32 = arith.constant 0 : i32
    %c2_i32 = arith.constant 2 : i32
    %6 = arith.muli %c2_i32, %c0_i32 : i32
    %c7_i32 = arith.constant 7 : i32
    %7 = arith.subi %c7_i32, %6 : i32
    %8 = arith.muli %arg0, %7 : i32
    %9 = arith.addi %c0_i32, %8 : i32
    %c0_7 = arith.constant 0 : index
    %10 = arith.index_cast %9 : i32 to index
    %c0_8 = arith.constant 0 : index
    %c0_9 = arith.constant 0 : index
    %11 = vector.load %arg1[%c0_7, %10, %c0_8, %c0_9] : memref<1x8x2x128xf32, #tpu.memory_space<vmem>>, vector<1x1x2x128xf32>
    %12 = vector.shape_cast %11 : vector<1x1x2x128xf32> to vector<2x128xf32>
    %c0_10 = arith.constant 0 : index
    %c0_11 = arith.constant 0 : index
    %13 = vector.load %arg4[%c0_10, %c0_11] : memref<2x32xf32, #tpu.memory_space<vmem>>, vector<2x32xf32>
    %cst_12 = arith.constant dense<0.000000e+00> : vector<2x128xf32>
    %14 = tpu.matmul %13, %5, %cst_12 {dimension_numbers = #tpu.dot_dimension_numbers<[1], [0], [0], [1], [0, 0, 1, 1], [], []>} : vector<2x32xf32>, vector<32x128xf32>, vector<2x128xf32> -> vector<2x128xf32>
    %15 = arith.addf %12, %14 : vector<2x128xf32>
    %16 = vector.extract_strided_slice %15 {offsets = [0, 0], sizes = [2, 32], strides = [1, 1]} : vector<2x128xf32> to vector<2x32xf32>
    %17 = arith.negf %16 : vector<2x32xf32>
    %18 = math.exp %17 : vector<2x32xf32>
    %cst_13 = arith.constant 1.000000e+00 : f32
    %19 = vector.broadcast %cst_13 : f32 to vector<2x32xf32>
    %20 = arith.addf %19, %18 : vector<2x32xf32>
    %21 = arith.divf %19, %20 : vector<2x32xf32>
    %22 = vector.extract_strided_slice %15 {offsets = [0, 32], sizes = [2, 32], strides = [1, 1]} : vector<2x128xf32> to vector<2x32xf32>
    %23 = arith.negf %22 : vector<2x32xf32>
    %24 = math.exp %23 : vector<2x32xf32>
    %cst_14 = arith.constant 1.000000e+00 : f32
    %25 = vector.broadcast %cst_14 : f32 to vector<2x32xf32>
    %26 = arith.addf %25, %24 : vector<2x32xf32>
    %27 = arith.divf %25, %26 : vector<2x32xf32>
    %28 = vector.extract_strided_slice %15 {offsets = [0, 64], sizes = [2, 32], strides = [1, 1]} : vector<2x128xf32> to vector<2x32xf32>
    %29 = math.tanh %28 : vector<2x32xf32>
    %30 = vector.extract_strided_slice %15 {offsets = [0, 96], sizes = [2, 32], strides = [1, 1]} : vector<2x128xf32> to vector<2x32xf32>
    %31 = arith.negf %30 : vector<2x32xf32>
    %32 = math.exp %31 : vector<2x32xf32>
    %cst_15 = arith.constant 1.000000e+00 : f32
    %33 = vector.broadcast %cst_15 : f32 to vector<2x32xf32>
    %34 = arith.addf %33, %32 : vector<2x32xf32>
    %35 = arith.divf %33, %34 : vector<2x32xf32>
    %c0_16 = arith.constant 0 : index
    %c0_17 = arith.constant 0 : index
    %36 = vector.load %arg5[%c0_16, %c0_17] : memref<2x32xf32, #tpu.memory_space<vmem>>, vector<2x32xf32>
    %37 = arith.mulf %27, %36 : vector<2x32xf32>
    %38 = arith.mulf %21, %29 : vector<2x32xf32>
    %39 = arith.addf %37, %38 : vector<2x32xf32>
    %40 = math.tanh %39 : vector<2x32xf32>
    %41 = arith.mulf %35, %40 : vector<2x32xf32>
    %c0_18 = arith.constant 0 : index
    %c0_19 = arith.constant 0 : index
    %42 = vector.load %arg4[%c0_18, %c0_19] : memref<2x32xf32, #tpu.memory_space<vmem>>, vector<2x32xf32>
    tpu.vector_store %arg4[%c0_18, %c0_19], %41 {strides = array<i32>} : memref<2x32xf32, #tpu.memory_space<vmem>>, vector<2x32xf32>,
    %c0_20 = arith.constant 0 : index
    %c0_21 = arith.constant 0 : index
    %43 = vector.load %arg5[%c0_20, %c0_21] : memref<2x32xf32, #tpu.memory_space<vmem>>, vector<2x32xf32>
    tpu.vector_store %arg5[%c0_20, %c0_21], %39 {strides = array<i32>} : memref<2x32xf32, #tpu.memory_space<vmem>>, vector<2x32xf32>,
    %c0_22 = arith.constant 0 : index
    %44 = arith.index_cast %9 : i32 to index
    %c0_23 = arith.constant 0 : index
    %c0_24 = arith.constant 0 : index
    %45 = vector.load %arg3[%c0_22, %44, %c0_23, %c0_24] : memref<1x8x2x32xf32, #tpu.memory_space<vmem>>, vector<1x1x2x32xf32>
    %46 = vector.shape_cast %45 : vector<1x1x2x32xf32> to vector<2x32xf32>
    %47 = vector.shape_cast %41 : vector<2x32xf32> to vector<1x1x2x32xf32>
    tpu.vector_store %arg3[%c0_22, %44, %c0_23, %c0_24], %47 {strides = array<i32>} : memref<1x8x2x32xf32, #tpu.memory_space<vmem>>, vector<1x1x2x32xf32>,
    %c1_i32 = arith.constant 1 : i32
    %c2_i32_25 = arith.constant 2 : i32
    %48 = arith.muli %c2_i32_25, %c1_i32 : i32
    %c7_i32_26 = arith.constant 7 : i32
    %49 = arith.subi %c7_i32_26, %48 : i32
    %50 = arith.muli %arg0, %49 : i32
    %51 = arith.addi %c1_i32, %50 : i32
    %c0_27 = arith.constant 0 : index
    %52 = arith.index_cast %51 : i32 to index
    %c0_28 = arith.constant 0 : index
    %c0_29 = arith.constant 0 : index
    %53 = vector.load %arg1[%c0_27, %52, %c0_28, %c0_29] : memref<1x8x2x128xf32, #tpu.memory_space<vmem>>, vector<1x1x2x128xf32>
    %54 = vector.shape_cast %53 : vector<1x1x2x128xf32> to vector<2x128xf32>
    %c0_30 = arith.constant 0 : index
    %c0_31 = arith.constant 0 : index
    %55 = vector.load %arg4[%c0_30, %c0_31] : memref<2x32xf32, #tpu.memory_space<vmem>>, vector<2x32xf32>
    %cst_32 = arith.constant dense<0.000000e+00> : vector<2x128xf32>
    %56 = tpu.matmul %55, %5, %cst_32 {dimension_numbers = #tpu.dot_dimension_numbers<[1], [0], [0], [1], [0, 0, 1, 1], [], []>} : vector<2x32xf32>, vector<32x128xf32>, vector<2x128xf32> -> vector<2x128xf32>
    %57 = arith.addf %54, %56 : vector<2x128xf32>
    %58 = vector.extract_strided_slice %57 {offsets = [0, 0], sizes = [2, 32], strides = [1, 1]} : vector<2x128xf32> to vector<2x32xf32>
    %59 = arith.negf %58 : vector<2x32xf32>
    %60 = math.exp %59 : vector<2x32xf32>
    %cst_33 = arith.constant 1.000000e+00 : f32
    %61 = vector.broadcast %cst_33 : f32 to vector<2x32xf32>
    %62 = arith.addf %61, %60 : vector<2x32xf32>
    %63 = arith.divf %61, %62 : vector<2x32xf32>
    %64 = vector.extract_strided_slice %57 {offsets = [0, 32], sizes = [2, 32], strides = [1, 1]} : vector<2x128xf32> to vector<2x32xf32>
    %65 = arith.negf %64 : vector<2x32xf32>
    %66 = math.exp %65 : vector<2x32xf32>
    %cst_34 = arith.constant 1.000000e+00 : f32
    %67 = vector.broadcast %cst_34 : f32 to vector<2x32xf32>
    %68 = arith.addf %67, %66 : vector<2x32xf32>
    %69 = arith.divf %67, %68 : vector<2x32xf32>
    %70 = vector.extract_strided_slice %57 {offsets = [0, 64], sizes = [2, 32], strides = [1, 1]} : vector<2x128xf32> to vector<2x32xf32>
    %71 = math.tanh %70 : vector<2x32xf32>
    %72 = vector.extract_strided_slice %57 {offsets = [0, 96], sizes = [2, 32], strides = [1, 1]} : vector<2x128xf32> to vector<2x32xf32>
    %73 = arith.negf %72 : vector<2x32xf32>
    %74 = math.exp %73 : vector<2x32xf32>
    %cst_35 = arith.constant 1.000000e+00 : f32
    %75 = vector.broadcast %cst_35 : f32 to vector<2x32xf32>
    %76 = arith.addf %75, %74 : vector<2x32xf32>
    %77 = arith.divf %75, %76 : vector<2x32xf32>
    %c0_36 = arith.constant 0 : index
    %c0_37 = arith.constant 0 : index
    %78 = vector.load %arg5[%c0_36, %c0_37] : memref<2x32xf32, #tpu.memory_space<vmem>>, vector<2x32xf32>
    %79 = arith.mulf %69, %78 : vector<2x32xf32>
    %80 = arith.mulf %63, %71 : vector<2x32xf32>
    %81 = arith.addf %79, %80 : vector<2x32xf32>
    %82 = math.tanh %81 : vector<2x32xf32>
    %83 = arith.mulf %77, %82 : vector<2x32xf32>
    %c0_38 = arith.constant 0 : index
    %c0_39 = arith.constant 0 : index
    %84 = vector.load %arg4[%c0_38, %c0_39] : memref<2x32xf32, #tpu.memory_space<vmem>>, vector<2x32xf32>
    tpu.vector_store %arg4[%c0_38, %c0_39], %83 {strides = array<i32>} : memref<2x32xf32, #tpu.memory_space<vmem>>, vector<2x32xf32>,
    %c0_40 = arith.constant 0 : index
    %c0_41 = arith.constant 0 : index
    %85 = vector.load %arg5[%c0_40, %c0_41] : memref<2x32xf32, #tpu.memory_space<vmem>>, vector<2x32xf32>
    tpu.vector_store %arg5[%c0_40, %c0_41], %81 {strides = array<i32>} : memref<2x32xf32, #tpu.memory_space<vmem>>, vector<2x32xf32>,
    %c0_42 = arith.constant 0 : index
    %86 = arith.index_cast %51 : i32 to index
    %c0_43 = arith.constant 0 : index
    %c0_44 = arith.constant 0 : index
    %87 = vector.load %arg3[%c0_42, %86, %c0_43, %c0_44] : memref<1x8x2x32xf32, #tpu.memory_space<vmem>>, vector<1x1x2x32xf32>
    %88 = vector.shape_cast %87 : vector<1x1x2x32xf32> to vector<2x32xf32>
    %89 = vector.shape_cast %83 : vector<2x32xf32> to vector<1x1x2x32xf32>
    tpu.vector_store %arg3[%c0_42, %86, %c0_43, %c0_44], %89 {strides = array<i32>} : memref<1x8x2x32xf32, #tpu.memory_space<vmem>>, vector<1x1x2x32xf32>,
    %c2_i32_45 = arith.constant 2 : i32
    %c2_i32_46 = arith.constant 2 : i32
    %90 = arith.muli %c2_i32_46, %c2_i32_45 : i32
    %c7_i32_47 = arith.constant 7 : i32
    %91 = arith.subi %c7_i32_47, %90 : i32
    %92 = arith.muli %arg0, %91 : i32
    %93 = arith.addi %c2_i32_45, %92 : i32
    %c0_48 = arith.constant 0 : index
    %94 = arith.index_cast %93 : i32 to index
    %c0_49 = arith.constant 0 : index
    %c0_50 = arith.constant 0 : index
    %95 = vector.load %arg1[%c0_48, %94, %c0_49, %c0_50] : memref<1x8x2x128xf32, #tpu.memory_space<vmem>>, vector<1x1x2x128xf32>
    %96 = vector.shape_cast %95 : vector<1x1x2x128xf32> to vector<2x128xf32>
    %c0_51 = arith.constant 0 : index
    %c0_52 = arith.constant 0 : index
    %97 = vector.load %arg4[%c0_51, %c0_52] : memref<2x32xf32, #tpu.memory_space<vmem>>, vector<2x32xf32>
    %cst_53 = arith.constant dense<0.000000e+00> : vector<2x128xf32>
    %98 = tpu.matmul %97, %5, %cst_53 {dimension_numbers = #tpu.dot_dimension_numbers<[1], [0], [0], [1], [0, 0, 1, 1], [], []>} : vector<2x32xf32>, vector<32x128xf32>, vector<2x128xf32> -> vector<2x128xf32>
    %99 = arith.addf %96, %98 : vector<2x128xf32>
    %100 = vector.extract_strided_slice %99 {offsets = [0, 0], sizes = [2, 32], strides = [1, 1]} : vector<2x128xf32> to vector<2x32xf32>
    %101 = arith.negf %100 : vector<2x32xf32>
    %102 = math.exp %101 : vector<2x32xf32>
    %cst_54 = arith.constant 1.000000e+00 : f32
    %103 = vector.broadcast %cst_54 : f32 to vector<2x32xf32>
    %104 = arith.addf %103, %102 : vector<2x32xf32>
    %105 = arith.divf %103, %104 : vector<2x32xf32>
    %106 = vector.extract_strided_slice %99 {offsets = [0, 32], sizes = [2, 32], strides = [1, 1]} : vector<2x128xf32> to vector<2x32xf32>
    %107 = arith.negf %106 : vector<2x32xf32>
    %108 = math.exp %107 : vector<2x32xf32>
    %cst_55 = arith.constant 1.000000e+00 : f32
    %109 = vector.broadcast %cst_55 : f32 to vector<2x32xf32>
    %110 = arith.addf %109, %108 : vector<2x32xf32>
    %111 = arith.divf %109, %110 : vector<2x32xf32>
    %112 = vector.extract_strided_slice %99 {offsets = [0, 64], sizes = [2, 32], strides = [1, 1]} : vector<2x128xf32> to vector<2x32xf32>
    %113 = math.tanh %112 : vector<2x32xf32>
    %114 = vector.extract_strided_slice %99 {offsets = [0, 96], sizes = [2, 32], strides = [1, 1]} : vector<2x128xf32> to vector<2x32xf32>
    %115 = arith.negf %114 : vector<2x32xf32>
    %116 = math.exp %115 : vector<2x32xf32>
    %cst_56 = arith.constant 1.000000e+00 : f32
    %117 = vector.broadcast %cst_56 : f32 to vector<2x32xf32>
    %118 = arith.addf %117, %116 : vector<2x32xf32>
    %119 = arith.divf %117, %118 : vector<2x32xf32>
    %c0_57 = arith.constant 0 : index
    %c0_58 = arith.constant 0 : index
    %120 = vector.load %arg5[%c0_57, %c0_58] : memref<2x32xf32, #tpu.memory_space<vmem>>, vector<2x32xf32>
    %121 = arith.mulf %111, %120 : vector<2x32xf32>
    %122 = arith.mulf %105, %113 : vector<2x32xf32>
    %123 = arith.addf %121, %122 : vector<2x32xf32>
    %124 = math.tanh %123 : vector<2x32xf32>
    %125 = arith.mulf %119, %124 : vector<2x32xf32>
    %c0_59 = arith.constant 0 : index
    %c0_60 = arith.constant 0 : index
    %126 = vector.load %arg4[%c0_59, %c0_60] : memref<2x32xf32, #tpu.memory_space<vmem>>, vector<2x32xf32>
    tpu.vector_store %arg4[%c0_59, %c0_60], %125 {strides = array<i32>} : memref<2x32xf32, #tpu.memory_space<vmem>>, vector<2x32xf32>,
    %c0_61 = arith.constant 0 : index
    %c0_62 = arith.constant 0 : index
    %127 = vector.load %arg5[%c0_61, %c0_62] : memref<2x32xf32, #tpu.memory_space<vmem>>, vector<2x32xf32>
    tpu.vector_store %arg5[%c0_61, %c0_62], %123 {strides = array<i32>} : memref<2x32xf32, #tpu.memory_space<vmem>>, vector<2x32xf32>,
    %c0_63 = arith.constant 0 : index
    %128 = arith.index_cast %93 : i32 to index
    %c0_64 = arith.constant 0 : index
    %c0_65 = arith.constant 0 : index
    %129 = vector.load %arg3[%c0_63, %128, %c0_64, %c0_65] : memref<1x8x2x32xf32, #tpu.memory_space<vmem>>, vector<1x1x2x32xf32>
    %130 = vector.shape_cast %129 : vector<1x1x2x32xf32> to vector<2x32xf32>
    %131 = vector.shape_cast %125 : vector<2x32xf32> to vector<1x1x2x32xf32>
    tpu.vector_store %arg3[%c0_63, %128, %c0_64, %c0_65], %131 {strides = array<i32>} : memref<1x8x2x32xf32, #tpu.memory_space<vmem>>, vector<1x1x2x32xf32>,
    %c3_i32 = arith.constant 3 : i32
    %c2_i32_66 = arith.constant 2 : i32
    %132 = arith.muli %c2_i32_66, %c3_i32 : i32
    %c7_i32_67 = arith.constant 7 : i32
    %133 = arith.subi %c7_i32_67, %132 : i32
    %134 = arith.muli %arg0, %133 : i32
    %135 = arith.addi %c3_i32, %134 : i32
    %c0_68 = arith.constant 0 : index
    %136 = arith.index_cast %135 : i32 to index
    %c0_69 = arith.constant 0 : index
    %c0_70 = arith.constant 0 : index
    %137 = vector.load %arg1[%c0_68, %136, %c0_69, %c0_70] : memref<1x8x2x128xf32, #tpu.memory_space<vmem>>, vector<1x1x2x128xf32>
    %138 = vector.shape_cast %137 : vector<1x1x2x128xf32> to vector<2x128xf32>
    %c0_71 = arith.constant 0 : index
    %c0_72 = arith.constant 0 : index
    %139 = vector.load %arg4[%c0_71, %c0_72] : memref<2x32xf32, #tpu.memory_space<vmem>>, vector<2x32xf32>
    %cst_73 = arith.constant dense<0.000000e+00> : vector<2x128xf32>
    %140 = tpu.matmul %139, %5, %cst_73 {dimension_numbers = #tpu.dot_dimension_numbers<[1], [0], [0], [1], [0, 0, 1, 1], [], []>} : vector<2x32xf32>, vector<32x128xf32>, vector<2x128xf32> -> vector<2x128xf32>
    %141 = arith.addf %138, %140 : vector<2x128xf32>
    %142 = vector.extract_strided_slice %141 {offsets = [0, 0], sizes = [2, 32], strides = [1, 1]} : vector<2x128xf32> to vector<2x32xf32>
    %143 = arith.negf %142 : vector<2x32xf32>
    %144 = math.exp %143 : vector<2x32xf32>
    %cst_74 = arith.constant 1.000000e+00 : f32
    %145 = vector.broadcast %cst_74 : f32 to vector<2x32xf32>
    %146 = arith.addf %145, %144 : vector<2x32xf32>
    %147 = arith.divf %145, %146 : vector<2x32xf32>
    %148 = vector.extract_strided_slice %141 {offsets = [0, 32], sizes = [2, 32], strides = [1, 1]} : vector<2x128xf32> to vector<2x32xf32>
    %149 = arith.negf %148 : vector<2x32xf32>
    %150 = math.exp %149 : vector<2x32xf32>
    %cst_75 = arith.constant 1.000000e+00 : f32
    %151 = vector.broadcast %cst_75 : f32 to vector<2x32xf32>
    %152 = arith.addf %151, %150 : vector<2x32xf32>
    %153 = arith.divf %151, %152 : vector<2x32xf32>
    %154 = vector.extract_strided_slice %141 {offsets = [0, 64], sizes = [2, 32], strides = [1, 1]} : vector<2x128xf32> to vector<2x32xf32>
    %155 = math.tanh %154 : vector<2x32xf32>
    %156 = vector.extract_strided_slice %141 {offsets = [0, 96], sizes = [2, 32], strides = [1, 1]} : vector<2x128xf32> to vector<2x32xf32>
    %157 = arith.negf %156 : vector<2x32xf32>
    %158 = math.exp %157 : vector<2x32xf32>
    %cst_76 = arith.constant 1.000000e+00 : f32
    %159 = vector.broadcast %cst_76 : f32 to vector<2x32xf32>
    %160 = arith.addf %159, %158 : vector<2x32xf32>
    %161 = arith.divf %159, %160 : vector<2x32xf32>
    %c0_77 = arith.constant 0 : index
    %c0_78 = arith.constant 0 : index
    %162 = vector.load %arg5[%c0_77, %c0_78] : memref<2x32xf32, #tpu.memory_space<vmem>>, vector<2x32xf32>
    %163 = arith.mulf %153, %162 : vector<2x32xf32>
    %164 = arith.mulf %147, %155 : vector<2x32xf32>
    %165 = arith.addf %163, %164 : vector<2x32xf32>
    %166 = math.tanh %165 : vector<2x32xf32>
    %167 = arith.mulf %161, %166 : vector<2x32xf32>
    %c0_79 = arith.constant 0 : index
    %c0_80 = arith.constant 0 : index
    %168 = vector.load %arg4[%c0_79, %c0_80] : memref<2x32xf32, #tpu.memory_space<vmem>>, vector<2x32xf32>
    tpu.vector_store %arg4[%c0_79, %c0_80], %167 {strides = array<i32>} : memref<2x32xf32, #tpu.memory_space<vmem>>, vector<2x32xf32>,
    %c0_81 = arith.constant 0 : index
    %c0_82 = arith.constant 0 : index
    %169 = vector.load %arg5[%c0_81, %c0_82] : memref<2x32xf32, #tpu.memory_space<vmem>>, vector<2x32xf32>
    tpu.vector_store %arg5[%c0_81, %c0_82], %165 {strides = array<i32>} : memref<2x32xf32, #tpu.memory_space<vmem>>, vector<2x32xf32>,
    %c0_83 = arith.constant 0 : index
    %170 = arith.index_cast %135 : i32 to index
    %c0_84 = arith.constant 0 : index
    %c0_85 = arith.constant 0 : index
    %171 = vector.load %arg3[%c0_83, %170, %c0_84, %c0_85] : memref<1x8x2x32xf32, #tpu.memory_space<vmem>>, vector<1x1x2x32xf32>
    %172 = vector.shape_cast %171 : vector<1x1x2x32xf32> to vector<2x32xf32>
    %173 = vector.shape_cast %167 : vector<2x32xf32> to vector<1x1x2x32xf32>
    tpu.vector_store %arg3[%c0_83, %170, %c0_84, %c0_85], %173 {strides = array<i32>} : memref<1x8x2x32xf32, #tpu.memory_space<vmem>>, vector<1x1x2x32xf32>,
    %c4_i32 = arith.constant 4 : i32
    %c2_i32_86 = arith.constant 2 : i32
    %174 = arith.muli %c2_i32_86, %c4_i32 : i32
    %c7_i32_87 = arith.constant 7 : i32
    %175 = arith.subi %c7_i32_87, %174 : i32
    %176 = arith.muli %arg0, %175 : i32
    %177 = arith.addi %c4_i32, %176 : i32
    %c0_88 = arith.constant 0 : index
    %178 = arith.index_cast %177 : i32 to index
    %c0_89 = arith.constant 0 : index
    %c0_90 = arith.constant 0 : index
    %179 = vector.load %arg1[%c0_88, %178, %c0_89, %c0_90] : memref<1x8x2x128xf32, #tpu.memory_space<vmem>>, vector<1x1x2x128xf32>
    %180 = vector.shape_cast %179 : vector<1x1x2x128xf32> to vector<2x128xf32>
    %c0_91 = arith.constant 0 : index
    %c0_92 = arith.constant 0 : index
    %181 = vector.load %arg4[%c0_91, %c0_92] : memref<2x32xf32, #tpu.memory_space<vmem>>, vector<2x32xf32>
    %cst_93 = arith.constant dense<0.000000e+00> : vector<2x128xf32>
    %182 = tpu.matmul %181, %5, %cst_93 {dimension_numbers = #tpu.dot_dimension_numbers<[1], [0], [0], [1], [0, 0, 1, 1], [], []>} : vector<2x32xf32>, vector<32x128xf32>, vector<2x128xf32> -> vector<2x128xf32>
    %183 = arith.addf %180, %182 : vector<2x128xf32>
    %184 = vector.extract_strided_slice %183 {offsets = [0, 0], sizes = [2, 32], strides = [1, 1]} : vector<2x128xf32> to vector<2x32xf32>
    %185 = arith.negf %184 : vector<2x32xf32>
    %186 = math.exp %185 : vector<2x32xf32>
    %cst_94 = arith.constant 1.000000e+00 : f32
    %187 = vector.broadcast %cst_94 : f32 to vector<2x32xf32>
    %188 = arith.addf %187, %186 : vector<2x32xf32>
    %189 = arith.divf %187, %188 : vector<2x32xf32>
    %190 = vector.extract_strided_slice %183 {offsets = [0, 32], sizes = [2, 32], strides = [1, 1]} : vector<2x128xf32> to vector<2x32xf32>
    %191 = arith.negf %190 : vector<2x32xf32>
    %192 = math.exp %191 : vector<2x32xf32>
    %cst_95 = arith.constant 1.000000e+00 : f32
    %193 = vector.broadcast %cst_95 : f32 to vector<2x32xf32>
    %194 = arith.addf %193, %192 : vector<2x32xf32>
    %195 = arith.divf %193, %194 : vector<2x32xf32>
    %196 = vector.extract_strided_slice %183 {offsets = [0, 64], sizes = [2, 32], strides = [1, 1]} : vector<2x128xf32> to vector<2x32xf32>
    %197 = math.tanh %196 : vector<2x32xf32>
    %198 = vector.extract_strided_slice %183 {offsets = [0, 96], sizes = [2, 32], strides = [1, 1]} : vector<2x128xf32> to vector<2x32xf32>
    %199 = arith.negf %198 : vector<2x32xf32>
    %200 = math.exp %199 : vector<2x32xf32>
    %cst_96 = arith.constant 1.000000e+00 : f32
    %201 = vector.broadcast %cst_96 : f32 to vector<2x32xf32>
    %202 = arith.addf %201, %200 : vector<2x32xf32>
    %203 = arith.divf %201, %202 : vector<2x32xf32>
    %c0_97 = arith.constant 0 : index
    %c0_98 = arith.constant 0 : index
    %204 = vector.load %arg5[%c0_97, %c0_98] : memref<2x32xf32, #tpu.memory_space<vmem>>, vector<2x32xf32>
    %205 = arith.mulf %195, %204 : vector<2x32xf32>
    %206 = arith.mulf %189, %197 : vector<2x32xf32>
    %207 = arith.addf %205, %206 : vector<2x32xf32>
    %208 = math.tanh %207 : vector<2x32xf32>
    %209 = arith.mulf %203, %208 : vector<2x32xf32>
    %c0_99 = arith.constant 0 : index
    %c0_100 = arith.constant 0 : index
    %210 = vector.load %arg4[%c0_99, %c0_100] : memref<2x32xf32, #tpu.memory_space<vmem>>, vector<2x32xf32>
    tpu.vector_store %arg4[%c0_99, %c0_100], %209 {strides = array<i32>} : memref<2x32xf32, #tpu.memory_space<vmem>>, vector<2x32xf32>,
    %c0_101 = arith.constant 0 : index
    %c0_102 = arith.constant 0 : index
    %211 = vector.load %arg5[%c0_101, %c0_102] : memref<2x32xf32, #tpu.memory_space<vmem>>, vector<2x32xf32>
    tpu.vector_store %arg5[%c0_101, %c0_102], %207 {strides = array<i32>} : memref<2x32xf32, #tpu.memory_space<vmem>>, vector<2x32xf32>,
    %c0_103 = arith.constant 0 : index
    %212 = arith.index_cast %177 : i32 to index
    %c0_104 = arith.constant 0 : index
    %c0_105 = arith.constant 0 : index
    %213 = vector.load %arg3[%c0_103, %212, %c0_104, %c0_105] : memref<1x8x2x32xf32, #tpu.memory_space<vmem>>, vector<1x1x2x32xf32>
    %214 = vector.shape_cast %213 : vector<1x1x2x32xf32> to vector<2x32xf32>
    %215 = vector.shape_cast %209 : vector<2x32xf32> to vector<1x1x2x32xf32>
    tpu.vector_store %arg3[%c0_103, %212, %c0_104, %c0_105], %215 {strides = array<i32>} : memref<1x8x2x32xf32, #tpu.memory_space<vmem>>, vector<1x1x2x32xf32>,
    %c5_i32 = arith.constant 5 : i32
    %c2_i32_106 = arith.constant 2 : i32
    %216 = arith.muli %c2_i32_106, %c5_i32 : i32
    %c7_i32_107 = arith.constant 7 : i32
    %217 = arith.subi %c7_i32_107, %216 : i32
    %218 = arith.muli %arg0, %217 : i32
    %219 = arith.addi %c5_i32, %218 : i32
    %c0_108 = arith.constant 0 : index
    %220 = arith.index_cast %219 : i32 to index
    %c0_109 = arith.constant 0 : index
    %c0_110 = arith.constant 0 : index
    %221 = vector.load %arg1[%c0_108, %220, %c0_109, %c0_110] : memref<1x8x2x128xf32, #tpu.memory_space<vmem>>, vector<1x1x2x128xf32>
    %222 = vector.shape_cast %221 : vector<1x1x2x128xf32> to vector<2x128xf32>
    %c0_111 = arith.constant 0 : index
    %c0_112 = arith.constant 0 : index
    %223 = vector.load %arg4[%c0_111, %c0_112] : memref<2x32xf32, #tpu.memory_space<vmem>>, vector<2x32xf32>
    %cst_113 = arith.constant dense<0.000000e+00> : vector<2x128xf32>
    %224 = tpu.matmul %223, %5, %cst_113 {dimension_numbers = #tpu.dot_dimension_numbers<[1], [0], [0], [1], [0, 0, 1, 1], [], []>} : vector<2x32xf32>, vector<32x128xf32>, vector<2x128xf32> -> vector<2x128xf32>
    %225 = arith.addf %222, %224 : vector<2x128xf32>
    %226 = vector.extract_strided_slice %225 {offsets = [0, 0], sizes = [2, 32], strides = [1, 1]} : vector<2x128xf32> to vector<2x32xf32>
    %227 = arith.negf %226 : vector<2x32xf32>
    %228 = math.exp %227 : vector<2x32xf32>
    %cst_114 = arith.constant 1.000000e+00 : f32
    %229 = vector.broadcast %cst_114 : f32 to vector<2x32xf32>
    %230 = arith.addf %229, %228 : vector<2x32xf32>
    %231 = arith.divf %229, %230 : vector<2x32xf32>
    %232 = vector.extract_strided_slice %225 {offsets = [0, 32], sizes = [2, 32], strides = [1, 1]} : vector<2x128xf32> to vector<2x32xf32>
    %233 = arith.negf %232 : vector<2x32xf32>
    %234 = math.exp %233 : vector<2x32xf32>
    %cst_115 = arith.constant 1.000000e+00 : f32
    %235 = vector.broadcast %cst_115 : f32 to vector<2x32xf32>
    %236 = arith.addf %235, %234 : vector<2x32xf32>
    %237 = arith.divf %235, %236 : vector<2x32xf32>
    %238 = vector.extract_strided_slice %225 {offsets = [0, 64], sizes = [2, 32], strides = [1, 1]} : vector<2x128xf32> to vector<2x32xf32>
    %239 = math.tanh %238 : vector<2x32xf32>
    %240 = vector.extract_strided_slice %225 {offsets = [0, 96], sizes = [2, 32], strides = [1, 1]} : vector<2x128xf32> to vector<2x32xf32>
    %241 = arith.negf %240 : vector<2x32xf32>
    %242 = math.exp %241 : vector<2x32xf32>
    %cst_116 = arith.constant 1.000000e+00 : f32
    %243 = vector.broadcast %cst_116 : f32 to vector<2x32xf32>
    %244 = arith.addf %243, %242 : vector<2x32xf32>
    %245 = arith.divf %243, %244 : vector<2x32xf32>
    %c0_117 = arith.constant 0 : index
    %c0_118 = arith.constant 0 : index
    %246 = vector.load %arg5[%c0_117, %c0_118] : memref<2x32xf32, #tpu.memory_space<vmem>>, vector<2x32xf32>
    %247 = arith.mulf %237, %246 : vector<2x32xf32>
    %248 = arith.mulf %231, %239 : vector<2x32xf32>
    %249 = arith.addf %247, %248 : vector<2x32xf32>
    %250 = math.tanh %249 : vector<2x32xf32>
    %251 = arith.mulf %245, %250 : vector<2x32xf32>
    %c0_119 = arith.constant 0 : index
    %c0_120 = arith.constant 0 : index
    %252 = vector.load %arg4[%c0_119, %c0_120] : memref<2x32xf32, #tpu.memory_space<vmem>>, vector<2x32xf32>
    tpu.vector_store %arg4[%c0_119, %c0_120], %251 {strides = array<i32>} : memref<2x32xf32, #tpu.memory_space<vmem>>, vector<2x32xf32>,
    %c0_121 = arith.constant 0 : index
    %c0_122 = arith.constant 0 : index
    %253 = vector.load %arg5[%c0_121, %c0_122] : memref<2x32xf32, #tpu.memory_space<vmem>>, vector<2x32xf32>
    tpu.vector_store %arg5[%c0_121, %c0_122], %249 {strides = array<i32>} : memref<2x32xf32, #tpu.memory_space<vmem>>, vector<2x32xf32>,
    %c0_123 = arith.constant 0 : index
    %254 = arith.index_cast %219 : i32 to index
    %c0_124 = arith.constant 0 : index
    %c0_125 = arith.constant 0 : index
    %255 = vector.load %arg3[%c0_123, %254, %c0_124, %c0_125] : memref<1x8x2x32xf32, #tpu.memory_space<vmem>>, vector<1x1x2x32xf32>
    %256 = vector.shape_cast %255 : vector<1x1x2x32xf32> to vector<2x32xf32>
    %257 = vector.shape_cast %251 : vector<2x32xf32> to vector<1x1x2x32xf32>
    tpu.vector_store %arg3[%c0_123, %254, %c0_124, %c0_125], %257 {strides = array<i32>} : memref<1x8x2x32xf32, #tpu.memory_space<vmem>>, vector<1x1x2x32xf32>,
    %c6_i32 = arith.constant 6 : i32
    %c2_i32_126 = arith.constant 2 : i32
    %258 = arith.muli %c2_i32_126, %c6_i32 : i32
    %c7_i32_127 = arith.constant 7 : i32
    %259 = arith.subi %c7_i32_127, %258 : i32
    %260 = arith.muli %arg0, %259 : i32
    %261 = arith.addi %c6_i32, %260 : i32
    %c0_128 = arith.constant 0 : index
    %262 = arith.index_cast %261 : i32 to index
    %c0_129 = arith.constant 0 : index
    %c0_130 = arith.constant 0 : index
    %263 = vector.load %arg1[%c0_128, %262, %c0_129, %c0_130] : memref<1x8x2x128xf32, #tpu.memory_space<vmem>>, vector<1x1x2x128xf32>
    %264 = vector.shape_cast %263 : vector<1x1x2x128xf32> to vector<2x128xf32>
    %c0_131 = arith.constant 0 : index
    %c0_132 = arith.constant 0 : index
    %265 = vector.load %arg4[%c0_131, %c0_132] : memref<2x32xf32, #tpu.memory_space<vmem>>, vector<2x32xf32>
    %cst_133 = arith.constant dense<0.000000e+00> : vector<2x128xf32>
    %266 = tpu.matmul %265, %5, %cst_133 {dimension_numbers = #tpu.dot_dimension_numbers<[1], [0], [0], [1], [0, 0, 1, 1], [], []>} : vector<2x32xf32>, vector<32x128xf32>, vector<2x128xf32> -> vector<2x128xf32>
    %267 = arith.addf %264, %266 : vector<2x128xf32>
    %268 = vector.extract_strided_slice %267 {offsets = [0, 0], sizes = [2, 32], strides = [1, 1]} : vector<2x128xf32> to vector<2x32xf32>
    %269 = arith.negf %268 : vector<2x32xf32>
    %270 = math.exp %269 : vector<2x32xf32>
    %cst_134 = arith.constant 1.000000e+00 : f32
    %271 = vector.broadcast %cst_134 : f32 to vector<2x32xf32>
    %272 = arith.addf %271, %270 : vector<2x32xf32>
    %273 = arith.divf %271, %272 : vector<2x32xf32>
    %274 = vector.extract_strided_slice %267 {offsets = [0, 32], sizes = [2, 32], strides = [1, 1]} : vector<2x128xf32> to vector<2x32xf32>
    %275 = arith.negf %274 : vector<2x32xf32>
    %276 = math.exp %275 : vector<2x32xf32>
    %cst_135 = arith.constant 1.000000e+00 : f32
    %277 = vector.broadcast %cst_135 : f32 to vector<2x32xf32>
    %278 = arith.addf %277, %276 : vector<2x32xf32>
    %279 = arith.divf %277, %278 : vector<2x32xf32>
    %280 = vector.extract_strided_slice %267 {offsets = [0, 64], sizes = [2, 32], strides = [1, 1]} : vector<2x128xf32> to vector<2x32xf32>
    %281 = math.tanh %280 : vector<2x32xf32>
    %282 = vector.extract_strided_slice %267 {offsets = [0, 96], sizes = [2, 32], strides = [1, 1]} : vector<2x128xf32> to vector<2x32xf32>
    %283 = arith.negf %282 : vector<2x32xf32>
    %284 = math.exp %283 : vector<2x32xf32>
    %cst_136 = arith.constant 1.000000e+00 : f32
    %285 = vector.broadcast %cst_136 : f32 to vector<2x32xf32>
    %286 = arith.addf %285, %284 : vector<2x32xf32>
    %287 = arith.divf %285, %286 : vector<2x32xf32>
    %c0_137 = arith.constant 0 : index
    %c0_138 = arith.constant 0 : index
    %288 = vector.load %arg5[%c0_137, %c0_138] : memref<2x32xf32, #tpu.memory_space<vmem>>, vector<2x32xf32>
    %289 = arith.mulf %279, %288 : vector<2x32xf32>
    %290 = arith.mulf %273, %281 : vector<2x32xf32>
    %291 = arith.addf %289, %290 : vector<2x32xf32>
    %292 = math.tanh %291 : vector<2x32xf32>
    %293 = arith.mulf %287, %292 : vector<2x32xf32>
    %c0_139 = arith.constant 0 : index
    %c0_140 = arith.constant 0 : index
    %294 = vector.load %arg4[%c0_139, %c0_140] : memref<2x32xf32, #tpu.memory_space<vmem>>, vector<2x32xf32>
    tpu.vector_store %arg4[%c0_139, %c0_140], %293 {strides = array<i32>} : memref<2x32xf32, #tpu.memory_space<vmem>>, vector<2x32xf32>,
    %c0_141 = arith.constant 0 : index
    %c0_142 = arith.constant 0 : index
    %295 = vector.load %arg5[%c0_141, %c0_142] : memref<2x32xf32, #tpu.memory_space<vmem>>, vector<2x32xf32>
    tpu.vector_store %arg5[%c0_141, %c0_142], %291 {strides = array<i32>} : memref<2x32xf32, #tpu.memory_space<vmem>>, vector<2x32xf32>,
    %c0_143 = arith.constant 0 : index
    %296 = arith.index_cast %261 : i32 to index
    %c0_144 = arith.constant 0 : index
    %c0_145 = arith.constant 0 : index
    %297 = vector.load %arg3[%c0_143, %296, %c0_144, %c0_145] : memref<1x8x2x32xf32, #tpu.memory_space<vmem>>, vector<1x1x2x32xf32>
    %298 = vector.shape_cast %297 : vector<1x1x2x32xf32> to vector<2x32xf32>
    %299 = vector.shape_cast %293 : vector<2x32xf32> to vector<1x1x2x32xf32>
    tpu.vector_store %arg3[%c0_143, %296, %c0_144, %c0_145], %299 {strides = array<i32>} : memref<1x8x2x32xf32, #tpu.memory_space<vmem>>, vector<1x1x2x32xf32>,
    %c7_i32_146 = arith.constant 7 : i32
    %c2_i32_147 = arith.constant 2 : i32
    %300 = arith.muli %c2_i32_147, %c7_i32_146 : i32
    %c7_i32_148 = arith.constant 7 : i32
    %301 = arith.subi %c7_i32_148, %300 : i32
    %302 = arith.muli %arg0, %301 : i32
    %303 = arith.addi %c7_i32_146, %302 : i32
    %c0_149 = arith.constant 0 : index
    %304 = arith.index_cast %303 : i32 to index
    %c0_150 = arith.constant 0 : index
    %c0_151 = arith.constant 0 : index
    %305 = vector.load %arg1[%c0_149, %304, %c0_150, %c0_151] : memref<1x8x2x128xf32, #tpu.memory_space<vmem>>, vector<1x1x2x128xf32>
    %306 = vector.shape_cast %305 : vector<1x1x2x128xf32> to vector<2x128xf32>
    %c0_152 = arith.constant 0 : index
    %c0_153 = arith.constant 0 : index
    %307 = vector.load %arg4[%c0_152, %c0_153] : memref<2x32xf32, #tpu.memory_space<vmem>>, vector<2x32xf32>
    %cst_154 = arith.constant dense<0.000000e+00> : vector<2x128xf32>
    %308 = tpu.matmul %307, %5, %cst_154 {dimension_numbers = #tpu.dot_dimension_numbers<[1], [0], [0], [1], [0, 0, 1, 1], [], []>} : vector<2x32xf32>, vector<32x128xf32>, vector<2x128xf32> -> vector<2x128xf32>
    %309 = arith.addf %306, %308 : vector<2x128xf32>
    %310 = vector.extract_strided_slice %309 {offsets = [0, 0], sizes = [2, 32], strides = [1, 1]} : vector<2x128xf32> to vector<2x32xf32>
    %311 = arith.negf %310 : vector<2x32xf32>
    %312 = math.exp %311 : vector<2x32xf32>
    %cst_155 = arith.constant 1.000000e+00 : f32
    %313 = vector.broadcast %cst_155 : f32 to vector<2x32xf32>
    %314 = arith.addf %313, %312 : vector<2x32xf32>
    %315 = arith.divf %313, %314 : vector<2x32xf32>
    %316 = vector.extract_strided_slice %309 {offsets = [0, 32], sizes = [2, 32], strides = [1, 1]} : vector<2x128xf32> to vector<2x32xf32>
    %317 = arith.negf %316 : vector<2x32xf32>
    %318 = math.exp %317 : vector<2x32xf32>
    %cst_156 = arith.constant 1.000000e+00 : f32
    %319 = vector.broadcast %cst_156 : f32 to vector<2x32xf32>
    %320 = arith.addf %319, %318 : vector<2x32xf32>
    %321 = arith.divf %319, %320 : vector<2x32xf32>
    %322 = vector.extract_strided_slice %309 {offsets = [0, 64], sizes = [2, 32], strides = [1, 1]} : vector<2x128xf32> to vector<2x32xf32>
    %323 = math.tanh %322 : vector<2x32xf32>
    %324 = vector.extract_strided_slice %309 {offsets = [0, 96], sizes = [2, 32], strides = [1, 1]} : vector<2x128xf32> to vector<2x32xf32>
    %325 = arith.negf %324 : vector<2x32xf32>
    %326 = math.exp %325 : vector<2x32xf32>
    %cst_157 = arith.constant 1.000000e+00 : f32
    %327 = vector.broadcast %cst_157 : f32 to vector<2x32xf32>
    %328 = arith.addf %327, %326 : vector<2x32xf32>
    %329 = arith.divf %327, %328 : vector<2x32xf32>
    %c0_158 = arith.constant 0 : index
    %c0_159 = arith.constant 0 : index
    %330 = vector.load %arg5[%c0_158, %c0_159] : memref<2x32xf32, #tpu.memory_space<vmem>>, vector<2x32xf32>
    %331 = arith.mulf %321, %330 : vector<2x32xf32>
    %332 = arith.mulf %315, %323 : vector<2x32xf32>
    %333 = arith.addf %331, %332 : vector<2x32xf32>
    %334 = math.tanh %333 : vector<2x32xf32>
    %335 = arith.mulf %329, %334 : vector<2x32xf32>
    %c0_160 = arith.constant 0 : index
    %c0_161 = arith.constant 0 : index
    %336 = vector.load %arg4[%c0_160, %c0_161] : memref<2x32xf32, #tpu.memory_space<vmem>>, vector<2x32xf32>
    tpu.vector_store %arg4[%c0_160, %c0_161], %335 {strides = array<i32>} : memref<2x32xf32, #tpu.memory_space<vmem>>, vector<2x32xf32>,
    %c0_162 = arith.constant 0 : index
    %c0_163 = arith.constant 0 : index
    %337 = vector.load %arg5[%c0_162, %c0_163] : memref<2x32xf32, #tpu.memory_space<vmem>>, vector<2x32xf32>
    tpu.vector_store %arg5[%c0_162, %c0_163], %333 {strides = array<i32>} : memref<2x32xf32, #tpu.memory_space<vmem>>, vector<2x32xf32>,
    %c0_164 = arith.constant 0 : index
    %338 = arith.index_cast %303 : i32 to index
    %c0_165 = arith.constant 0 : index
    %c0_166 = arith.constant 0 : index
    %339 = vector.load %arg3[%c0_164, %338, %c0_165, %c0_166] : memref<1x8x2x32xf32, #tpu.memory_space<vmem>>, vector<1x1x2x32xf32>
    %340 = vector.shape_cast %339 : vector<1x1x2x32xf32> to vector<2x32xf32>
    %341 = vector.shape_cast %335 : vector<2x32xf32> to vector<1x1x2x32xf32>
    tpu.vector_store %arg3[%c0_164, %338, %c0_165, %c0_166], %341 {strides = array<i32>} : memref<1x8x2x32xf32, #tpu.memory_space<vmem>>, vector<1x1x2x32xf32>,
    %c8_i32 = arith.constant 8 : i32
    return
  }
  func.func @transform_0(%arg0: i32) -> (i32, i32, i32, i32) {
    %c0_i32 = arith.constant 0 : i32
    %c0_i32_0 = arith.constant 0 : i32
    %c0_i32_1 = arith.constant 0 : i32
    %c0_i32_2 = arith.constant 0 : i32
    return %arg0, %c0_i32, %c0_i32_0, %c0_i32_1 : i32, i32, i32, i32
  }
  func.func @transform_1(%arg0: i32) -> (i32, i32, i32) {
    %c0_i32 = arith.constant 0 : i32
    %c0_i32_0 = arith.constant 0 : i32
    %c0_i32_1 = arith.constant 0 : i32
    return %arg0, %c0_i32, %c0_i32_0 : i32, i32, i32
  }
  func.func @transform_2(%arg0: i32) -> (i32, i32, i32, i32) {
    %c0_i32 = arith.constant 0 : i32
    %c0_i32_0 = arith.constant 0 : i32
    %c0_i32_1 = arith.constant 0 : i32
    %c0_i32_2 = arith.constant 0 : i32
    return %arg0, %c0_i32, %c0_i32_0, %c0_i32_1 : i32, i32, i32, i32
  }
}

</mosaic_0001>

<bundles_post_ra>
// kernel: seq_tagger_forward.5
= control target key start
LH: loop header
LB: loop body
LE: loop exit
PB: predicated region body
PF: predicated region fallthrough
CT: control target
= control target key end

     0   :  { %s230_s23 = smov 32   ;;  %vm38_vm0 = vcmask 261120   ;;  %vm41_vm1 = vcmask 523264   ;;  %s323_s1 = inlined_call_operand.vmem [shape: f32[2,16,32], index: 1, kind: input, shape index: {}, may-alias: {0,1}]   ;;  %s324_s0 = inlined_call_operand.vmem [shape: f32[2,16,32], index: 0, kind: input, shape index: {}, may-alias: {0,1}]   ;;  %s325_s4 = inlined_call_operand.vmem [shape: f32[64,128], index: 4, kind: input, shape index: {}]   ;;  %s326_s2 = inlined_call_operand.vmem [shape: f32[1,64], index: 2, kind: input, shape index: {}]   ;;  %s327_s3 = inlined_call_operand.vmem [shape: f32[1,64], index: 3, kind: input, shape index: {}]   ;;  %s328_s5 = inlined_call_operand.vmem [shape: f32[1,128], index: 5, kind: input, shape index: {}]   ;;  %s329_s6 = inlined_call_operand.vmem [shape: f32[16,128], index: 6, kind: output, shape index: {}]  }
   0x1   :  { %v189_v0 = vld [vmem:[%s323_s1 + $0x10] sm:$0xff]  ;;  %v190_v1 = vld [vmem:[%s323_s1 + $0x18] sm:$0xff]  ;;  %v26_v2 = vld [vmem:[%s324_s0] sm:$0xff] }
   0x2   :  { %32 = vrot.lane.b32.xlu0 %v189_v0, %s230_s23  ;;  %v27_v6 = vld [vmem:[%s324_s0 + $0x8] sm:$0xff]  ;;  %v94_v20 = vld [vmem:[%s325_s4 + $0x38] sm:$0xff]  ;;  %v93_v21 = vld [vmem:[%s325_s4 + $0x30] sm:$0xff] }
   0x3   :  { %206 = vmatprep.subr.mxu0 %v94_v20  ;;  %v92_v22 = vld [vmem:[%s325_s4 + $0x28] sm:$0xff]  ;;  %v91_v23 = vld [vmem:[%s325_s4 + $0x20] sm:$0xff]  ;;  %v90_v24 = vld [vmem:[%s325_s4 + $0x18] sm:$0xff] }
   0x4   :  { %207 = vmatpush3.msra.mxu0 %v94_v20  ;;  %v89_v25 = vld [vmem:[%s325_s4 + $0x10] sm:$0xff]  ;;  %v88_v26 = vld [vmem:[%s325_s4 + $0x8] sm:$0xff]  ;;  %v87_v27 = vld [vmem:[%s325_s4] sm:$0xff] }
   0x5   :  { %208 = vmatprep.subr.mxu0 %v93_v21  ;;  %v191_v35 = vld [vmem:[%s326_s2] ss:$0 sm:$0xff] }
   0x6   :  { %34 = vrot.lane.b32.xlu0 %v190_v1, %s230_s23  ;;  %209 = vmatpush3.msra.mxu0 %v93_v21  ;;  %v192_v37 = vld [vmem:[%s327_s3] ss:$0 sm:$0xff] }
   0x7   :  { %210 = vmatprep.subr.mxu0 %v92_v22  ;;  %v193_v44 = vld [vmem:[%s328_s5] ss:$0 sm:$0xff] }
   0x8   :  { %211 = vmatpush3.msra.mxu0 %v92_v22 }
   0x9   :  { %212 = vmatprep.subr.mxu0 %v91_v23 }
   0xa   :  { %213 = vmatpush3.msra.mxu0 %v91_v23 }
   0xb   :  { %214 = vmatprep.subr.mxu0 %v90_v24 }
   0xc   :  { %215 = vmatpush3.msra.mxu0 %v90_v24 }
   0xd   :  { %216 = vmatprep.subr.mxu0 %v89_v25 }
   0xe   :  { %217 = vmatpush3.msra.mxu0 %v89_v25 }
   0xf   :  { %218 = vmatprep.subr.mxu0 %v88_v26 }
  0x10   :  { %219 = vmatpush3.msra.mxu0 %v88_v26 }
  0x11   :  { %220 = vmatprep.subr.mxu0 %v87_v27 }
  0x12   :  { %221 = vmatpush3.msra.mxu0 %v87_v27 }
  0x74   :  { %v33_v3 = vpop.permute.xlu0 %32 }
  0x75   :  { %v39_v4 = vsel %vm38_vm0, %v26_v2, %v33_v3 }
  0x76   :  { %v42_v5 = vsel %vm41_vm1, %v39_v4, 0.0 }
  0x77   :  { %43 = vadd.xlane.f32.xlu1 %v42_v5 }
  0x78   :  { %v35_v7 = vpop.permute.xlu0 %34 }
  0x79   :  { %v40_v8 = vsel %vm38_vm0, %v27_v6, %v35_v7 }
  0x7a   :  { %v45_v9 = vsel %vm41_vm1, %v40_v8, 0.0 }
  0x7b   :  { %46 = vadd.xlane.f32.xlu1 %v45_v9 }
 0x100   :  { %v44_v10 = vpop.xlane.xlu1 %43 }
 0x101   :  { %v49_v11 = vmul.f32 0.015625, %v44_v10 }
 0x103   :  { %v51_v12 = vsub.f32 %v39_v4, %v49_v11 }
 0x104   :  { %v47_v13 = vpop.xlane.xlu1 %46 }
 0x105   :  { %v50_v14 = vmul.f32 0.015625, %v47_v13  ;;  %v53_v15 = vmul.f32 %v51_v12, %v51_v12 }
 0x107   :  { %v52_v16 = vsub.f32 %v40_v8, %v50_v14  ;;  %v55_v17 = vsel %vm41_vm1, %v53_v15, 0.0 }
 0x108   :  { %56 = vadd.xlane.f32.xlu0 %v55_v17 }
 0x109   :  { %v54_v18 = vmul.f32 %v52_v16, %v52_v16 }
 0x10b   :  { %v58_v19 = vsel %vm41_vm1, %v54_v18, 0.0 }
 0x10c   :  { %59 = vadd.xlane.f32.xlu1 %v58_v19 }
 0x191   :  { %v57_v28 = vpop.xlane.xlu0 %56 }
 0x192   :  { %v61_v29 = vmul.f32 0.015625, %v57_v28 }
 0x194   :  { %v63_v30 = vadd.f32 1e-05, %v61_v29 }
 0x195   :  { %v60_v31 = vpop.xlane.xlu1 %59 }
 0x196   :  { %226 = vrsqrt.f32 %v63_v30  ;;  %v62_v32 = vmul.f32 0.015625, %v60_v31 }
 0x198   :  { %v64_v33 = vadd.f32 1e-05, %v62_v32 }
 0x19a   :  { %228 = vrsqrt.f32 %v64_v33 }
 0x1a3   :  { %v227_v34 = vpop.eup %226 }
 0x1a4   :  { %v67_v36 = vmul.f32 %v227_v34, %v51_v12 }
 0x1a6   :  { %v76_v38 = vmul.f32 %v191_v35, %v67_v36 }
 0x1a7   :  { %v229_v39 = vpop.eup %228 }
 0x1a8   :  { %v68_v40 = vmul.f32 %v229_v39, %v52_v16  ;;  %v85_v41 = vadd.f32 %v192_v37, %v76_v38 }
 0x1aa   :  { %v77_v42 = vmul.f32 %v191_v35, %v68_v40  ;;  %222 = vmatprep.mubr.msk.f32.mxu0 %vm41_vm1, %v85_v41 }
 0x1ac   :  { %v86_v43 = vadd.f32 %v192_v37, %v77_v42 }
 0x1ae   :  { %223 = vmatmul.mubr.msk.f32.vlgmr.msra.gmra.mxu0 %vm41_vm1, %v86_v43 }
 0x26e   :  { %v224_v45 = vpop.f32.mrf.mxu0 }
 0x26f   :  { %v180_v46 = vadd.f32 %v224_v45, %v193_v44 }
 0x270   :  { %v174_v47 = vpop.f32.mrf.mxu0 }
 0x271   :  { %184 = vst [vmem:[%s329_s6 + $0x8] sm:$0xff] %v180_v46  ;;  %v175_v48 = vadd.f32 %v193_v44, %v174_v47 }
 0x273   :  { %183 = vst [vmem:[%s329_s6] sm:$0xff] %v175_v48 }

// kernel: seq_tagger_forward.3
= control target key start
LH: loop header
LB: loop body
LE: loop exit
PB: predicated region body
PF: predicated region fallthrough
CT: control target
= control target key end

     0   :  { %vm22_vm0 = vcmask 261120   ;;  %s402_s0 = inlined_call_operand.vmem [shape: f32[16,32], index: 0, kind: input, shape index: {}]   ;;  %s403_s3 = inlined_call_operand.vmem [shape: f32[2,32,128], index: 3, kind: input, shape index: {}]   ;;  %s404_s1 = inlined_call_operand.vmem [shape: f32[1,32], index: 1, kind: input, shape index: {}]   ;;  %s405_s2 = inlined_call_operand.vmem [shape: f32[1,32], index: 2, kind: input, shape index: {}]   ;;  %s406_s4 = inlined_call_operand.vmem [shape: f32[2,1,128], index: 4, kind: input, shape index: {}]   ;;  %s407_s5 = inlined_call_operand.vmem [shape: f32[2,16,128], index: 5, kind: output, shape index: {}]  }
   0x1   :  { %v20_v0 = vld [vmem:[%s402_s0] sm:$0xff]  ;;  %v21_v1 = vld [vmem:[%s402_s0 + $0x8] sm:$0xff]  ;;  %v71_v14 = vld [vmem:[%s403_s3 + $0x18] sm:$0xff] }
   0x2   :  { %v23_v2 = vsel %vm22_vm0, %v20_v0, 0.0  ;;  %v26_v3 = vsel %vm22_vm0, %v21_v1, 0.0  ;;  %v265_v15 = vld [vmem:[%s403_s3 + $0x38] sm:$0xff]  ;;  %v70_v16 = vld [vmem:[%s403_s3 + $0x10] sm:$0xff]  ;;  %284 = vmatprep.subr.mxu0 %v71_v14  ;;  %v69_v18 = vld [vmem:[%s403_s3 + $0x8] sm:$0xff] }
   0x3   :  { %24 = vadd.xlane.f32.xlu0 %v23_v2  ;;  %295 = vmatprep.subr.mxu1 %v265_v15  ;;  %v264_v17 = vld [vmem:[%s403_s3 + $0x30] sm:$0xff]  ;;  %v263_v19 = vld [vmem:[%s403_s3 + $0x28] sm:$0xff]  ;;  %v68_v20 = vld [vmem:[%s403_s3] sm:$0xff] }
   0x4   :  { %285 = vmatpush3.msra.mxu0 %v71_v14  ;;  %296 = vmatpush3.msra.mxu1 %v265_v15  ;;  %v262_v21 = vld [vmem:[%s403_s3 + $0x20] sm:$0xff] }
   0x5   :  { %286 = vmatprep.subr.mxu0 %v70_v16  ;;  %297 = vmatprep.subr.mxu1 %v264_v17  ;;  %v257_v29 = vld [vmem:[%s404_s1] ss:$0 sm:$0xff]  ;;  %v267_v39 = vld [vmem:[%s406_s4 + $0x1] ss:$0 sm:$0xff] }
   0x6   :  { %287 = vmatpush3.msra.mxu0 %v70_v16  ;;  %298 = vmatpush3.msra.mxu1 %v264_v17  ;;  %v258_v31 = vld [vmem:[%s405_s2] ss:$0 sm:$0xff] }
   0x7   :  { %27 = vadd.xlane.f32.xlu0 %v26_v3  ;;  %288 = vmatprep.subr.mxu0 %v69_v18  ;;  %v259_v38 = vld [vmem:[%s406_s4] ss:$0 sm:$0xff] }
   0x8   :  { %289 = vmatpush3.msra.mxu0 %v69_v18  ;;  %299 = vmatprep.subr.mxu1 %v263_v19 }
   0x9   :  { %300 = vmatpush3.msra.mxu1 %v263_v19  ;;  %290 = vmatprep.subr.mxu0 %v68_v20 }
   0xa   :  { %301 = vmatprep.subr.mxu1 %v262_v21  ;;  %291 = vmatpush3.msra.mxu0 %v68_v20 }
   0xb   :  { %302 = vmatpush3.msra.mxu1 %v262_v21 }
  0x8c   :  { %v25_v4 = vpop.xlane.xlu0 %24 }
  0x8d   :  { %v30_v5 = vmul.f32 0.03125, %v25_v4 }
  0x8f   :  { %v32_v6 = vsub.f32 %v20_v0, %v30_v5 }
  0x90   :  { %v28_v7 = vpop.xlane.xlu0 %27 }
  0x91   :  { %v31_v8 = vmul.f32 0.03125, %v28_v7  ;;  %v34_v9 = vmul.f32 %v32_v6, %v32_v6 }
  0x93   :  { %v33_v10 = vsub.f32 %v21_v1, %v31_v8  ;;  %v36_v11 = vsel %vm22_vm0, %v34_v9, 0.0 }
  0x94   :  { %37 = vadd.xlane.f32.xlu1 %v36_v11 }
  0x95   :  { %v35_v12 = vmul.f32 %v33_v10, %v33_v10 }
  0x97   :  { %v39_v13 = vsel %vm22_vm0, %v35_v12, 0.0 }
  0x98   :  { %40 = vadd.xlane.f32.xlu1 %v39_v13 }
 0x11d   :  { %v38_v22 = vpop.xlane.xlu1 %37 }
 0x11e   :  { %v42_v23 = vmul.f32 0.03125, %v38_v22 }
 0x120   :  { %v44_v24 = vadd.f32 1e-05, %v42_v23 }
 0x121   :  { %v41_v25 = vpop.xlane.xlu1 %40 }
 0x122   :  { %306 = vrsqrt.f32 %v44_v24  ;;  %v43_v26 = vmul.f32 0.03125, %v41_v25 }
 0x124   :  { %v45_v27 = vadd.f32 1e-05, %v43_v26 }
 0x126   :  { %308 = vrsqrt.f32 %v45_v27 }
 0x12f   :  { %v307_v28 = vpop.eup %306 }
 0x130   :  { %v48_v30 = vmul.f32 %v307_v28, %v32_v6 }
 0x132   :  { %v57_v32 = vmul.f32 %v257_v29, %v48_v30 }
 0x133   :  { %v309_v33 = vpop.eup %308 }
 0x134   :  { %v49_v34 = vmul.f32 %v309_v33, %v33_v10  ;;  %v66_v35 = vadd.f32 %v258_v31, %v57_v32 }
 0x136   :  { %v58_v36 = vmul.f32 %v257_v29, %v49_v34  ;;  %292 = vmatprep.mubr.msk.f32.mxu0 %vm22_vm0, %v66_v35  ;;  %303 = vmatprep.mubr.msk.f32.mxu1 %vm22_vm0, %v66_v35 }
 0x138   :  { %v67_v37 = vadd.f32 %v258_v31, %v58_v36 }
 0x13a   :  { %293 = vmatmul.mubr.msk.f32.vlgmr.msra.gmra.mxu0 %vm22_vm0, %v67_v37  ;;  %304 = vmatmul.mubr.msk.f32.vlgmr.msra.gmra.mxu1 %vm22_vm0, %v67_v37 }
 0x1fa   :  { %v294_v40 = vpop.f32.mrf.mxu0  ;;  %v305_v41 = vpop.f32.mrf.mxu1 }
 0x1fb   :  { %v157_v42 = vadd.f32 %v294_v40, %v259_v38  ;;  %v247_v43 = vadd.f32 %v305_v41, %v267_v39 }
 0x1fc   :  { %v151_v44 = vpop.f32.mrf.mxu0  ;;  %v241_v45 = vpop.f32.mrf.mxu1 }
 0x1fd   :  { %161 = vst [vmem:[%s407_s5 + $0x8] sm:$0xff] %v157_v42  ;;  %271 = vst [vmem:[%s407_s5 + $0x18] sm:$0xff] %v247_v43  ;;  %v152_v46 = vadd.f32 %v259_v38, %v151_v44  ;;  %v242_v47 = vadd.f32 %v267_v39, %v241_v45 }
 0x1ff   :  { %160 = vst [vmem:[%s407_s5] sm:$0xff] %v152_v46  ;;  %270 = vst [vmem:[%s407_s5 + $0x10] sm:$0xff] %v242_v47 }

// kernel: seq_tagger_forward.4
= control target key start
LH: loop header
LB: loop body
LE: loop exit
PB: predicated region body
PF: predicated region fallthrough
CT: control target
= control target key end

     0   :  { %s1549_s9 = smov 0   ;;  %s1813_s0 = inlined_call_operand.vmem [shape: f32[2,8,2,128], index: 0, kind: input, shape index: {}]   ;;  %s1814_s1 = inlined_call_operand.vmem [shape: f32[2,32,128], index: 1, kind: input, shape index: {}]   ;;  %s1815_s2 = inlined_call_operand.vmem [shape: f32[2,8,2,32], index: 2, kind: output, shape index: {}]  }
   0x1 LB: > { %s1555_s10 = sadd.s32 4294967295, %s1527_s9   ;;  %p1262_p0 = scmp.ge.s32.totalorder %s1527_s9, 1  ;;  %s1527_s9 = sphi %s1549_s9, %s12_s9  }
   0x2   : > { %p122_p1 = scmp.lt.s32.totalorder %s1527_s9, 3 }
   0x4   : > { %p123_p2 = pnand %p1262_p0, %p122_p1 }
   0x5   : > { %p149_p3 = scmp.lt.s32.totalorder (!%p123_p2), %s1555_s10, 1  ;;  %s1269_s17 = smul.u32 (!%p123_p2), 14, %s1555_s10 }
   0x6   : > { %126 = sbr.rel (%p123_p2) target bundleno = 5592 (0x15d8), region = 28  ;;  %s1531_s22 = smov (!%p123_p2), 64  }
   0x7   : > { %s1532_s23 = smov (!%p123_p2), 32   ;;  %s1533_s24 = smov (!%p123_p2), 96  }
   0x8   : > { %s1272_s29 = smul.u32 (!%p123_p2), 10, %s1555_s10  ;;  %s1284_s7 = sshll.u32 (!%p123_p2), %s1555_s10, 1 }
   0x9   : > { %s1278_s4 = smul.u32 (!%p123_p2), 6, %s1555_s10 }
   0xa   : > { %s1299_s19 = smul.u32 (!%p123_p2), 4294967286, %s1555_s10 }
   0xb   : > { %vm164_vm0 = vcmask 254976   ;;  %v1529_v0 = vmov 0.0   ;;  %vm1530_vm1 = vmmov 0   ;;  %s1568_s11 = scalar_select %p149_p3, %s1555_s10, 1  ;;  %vm176_vm2 = vcmask 261120  }
   0xc   : > { %1356 = vmatprep.subr.mxu0 %v1529_v0  ;;  %1364 = vmatprep.mubr.msk.f32.mxu0 %vm1530_vm1, %v1529_v0  ;;  %165 = vst.msk [vmem:[#allocation2] sm:$0x3] %vm164_vm0, %v1529_v0  ;;  %166 = vst.msk [vmem:[#allocation3] sm:$0x3] %vm164_vm0, %v1529_v0  ;;  %s1305_s26 = smul.u32 4294967282, %s1555_s10 }
   0xd   : > { %1367 = vmatprep.subr.mxu1 %v1529_v0  ;;  %1375 = vmatprep.mubr.msk.f32.mxu1 %vm1530_vm1, %v1529_v0  ;;  %s1314_s12 = sshll.u32 %s1568_s11, 5  ;;  %s1313_s16 = sshll.u32 %s1568_s11, 4 }
   0xe   : > { %s158_s15 = scalar_lea.vmem %s1814_s1, %s1314_s12  ;;  %s1619_s20 = scalar_lea.vmem %s1813_s0, %s1313_s16 }
   0xf   : > { %v1577_v1 = vld [vmem:[%s158_s15 + $0x18] sm:$0xff]  ;;  %v1579_v2 = vld [vmem:[%s158_s15 + $0x10] sm:$0xff]  ;;  %v1584_v3 = vld [vmem:[%s158_s15 + $0x8] sm:$0xff]  ;;  %s173_s21 = scalar_lea.vmem %s1619_s20, %s1269_s17  ;;  %s1637_s27 = scalar_lea.vmem %s1815_s2, %s1313_s16 }
  0x10   : > { %1357 = vmatpush3.msra.mxu0 %v1577_v1  ;;  %1368 = vmatpush3.msra.mxu1 %v1577_v1  ;;  %v1590_v4 = vld [vmem:[%s158_s15] sm:$0xff]  ;;  %s290_s28 = scalar_lea.vmem %s1637_s27, %s1269_s17  ;;  %s1180_s30 = scalar_lea.vmem %s1619_s20, %s1272_s29 }
  0x11   : > { %1358 = vmatprep.subr.mxu0 %v1529_v0  ;;  %1369 = vmatprep.subr.mxu1 %v1529_v0  ;;  %v174_v6 = vld [vmem:[%s173_s21] sm:$0x3]  ;;  %v1273_v29 = vld [vmem:[%s1180_s30 + $0x2] sm:$0x3]  ;;  %s1184_s3 = scalar_lea.vmem %s1637_s27, %s1272_s29  ;;  %s1188_s5 = scalar_lea.vmem %s1619_s20, %s1278_s4 }
  0x12   : > { %1359 = vmatpush3.msra.mxu0 %v1579_v2  ;;  %1370 = vmatpush3.msra.mxu1 %v1579_v2  ;;  %v1279_v51 = vld [vmem:[%s1188_s5 + $0x4] sm:$0x3]  ;;  %s1192_s6 = scalar_lea.vmem %s1637_s27, %s1278_s4  ;;  %s1195_s8 = scalar_lea.vmem %s1619_s20, %s1284_s7 }
  0x13   : > { %1360 = vmatprep.subr.mxu0 %v1529_v0  ;;  %1371 = vmatprep.subr.mxu1 %v1529_v0  ;;  %v175_v5 = vld [vmem:[#allocation2] sm:$0x3]  ;;  %v258_v11 = vld [vmem:[#allocation3] sm:$0x3]  ;;  %s1198_s11 = scalar_lea.vmem %s1637_s27, %s1284_s7  ;;  %s654_s12 = ssub.s32 4, %s1555_s10 }
  0x14   : > { %1361 = vmatpush3.msra.mxu0 %v1584_v3  ;;  %1372 = vmatpush3.msra.mxu1 %v1584_v3  ;;  %s1736_s13 = sshll.u32 %s654_s12, 1  ;;  %s1293_s16 = smul.u32 4294967290, %s1555_s10 }
  0x15   : > { %1362 = vmatprep.subr.mxu0 %v1529_v0  ;;  %1373 = vmatprep.subr.mxu1 %v1529_v0  ;;  %s656_s14 = scalar_lea.vmem %s1619_s20, %s1736_s13  ;;  %s772_s15 = scalar_lea.vmem %s1637_s27, %s1736_s13 }
  0x16   : > { %1363 = vmatpush3.msra.mxu0 %v1590_v4  ;;  %1374 = vmatpush3.msra.mxu1 %v1590_v4  ;;  %s1206_s17 = scalar_lea.vmem %s1619_s20, %s1293_s16  ;;  %s1210_s18 = scalar_lea.vmem %s1637_s27, %s1293_s16 }
  0x17   : > { %1365 = vmatmul.mubr.msk.f32.vlgmr.msra.gmra.mxu0 %vm176_vm2, %v175_v5  ;;  %1378 = vmatprep.subr.mxu0 %v1529_v0  ;;  %s1214_s21 = scalar_lea.vmem %s1619_s20, %s1299_s19  ;;  %s1218_s25 = scalar_lea.vmem %s1637_s27, %s1299_s19 }
  0x18   : > { %1379 = vmatpush3.msra.mxu0 %v1577_v1  ;;  %1386 = vmatprep.mubr.msk.f32.mxu0 %vm1530_vm1, %v1529_v0 }
  0x19   : > { %1380 = vmatprep.subr.mxu0 %v1529_v0  ;;  %1389 = vmatprep.subr.mxu1 %v1529_v0 }
  0x1a   : > { %1381 = vmatpush3.msra.mxu0 %v1579_v2 }
  0x1b   : > { %1382 = vmatprep.subr.mxu0 %v1529_v0 }
  0x1c   : > { %1383 = vmatpush3.msra.mxu0 %v1584_v3 }
  0x1d   : > { %1384 = vmatprep.subr.mxu0 %v1529_v0 }
  0x1e   : > { %1385 = vmatpush3.msra.mxu0 %v1590_v4 }
  0x1f   : > { %1400 = vmatprep.subr.mxu0 %v1529_v0 }
  0xd7   : > { %v246_v7 = vpop.f32.mrf.mxu0 }
  0xd8   : > { %v250_v8 = vadd.f32 %v246_v7, %v174_v6 }
  0xd9   : > { %v1366_v9 = vpop.f32.mrf.mxu0 }
  0xda   : > { %1457 = vtanh.f32 %v250_v8  ;;  %v1271_v12 = vmul.f32 -1.442695, %v250_v8 }
  0xdc   : > { %1459 = vpow2.f32 %v1271_v12 }
  0xe7   : > { %v1458_v10 = vpop.eup %1457 }
  0xe8   : > { %265 = vrot.lane.b32.xlu0 %v1458_v10, %s1531_s22 }
  0xe9   : > { %v1460_v13 = vpop.eup %1459 }
  0xea   : > { %v254_v14 = vadd.f32 1.0, %v1460_v13 }
  0xec   : > { %260 = vrot.lane.b32.xlu0 %v258_v11, %s1532_s23  ;;  %1461 = vrcp.f32 %v254_v14  ;;  %v1285_v14 = vld [vmem:[%s1195_s8 + $0x6] sm:$0x3] }
  0xf9   : > { %v1462_v15 = vpop.eup %1461 }
 0x15a   : > { %v266_v16 = vpop.permute.xlu0 %265 }
 0x15b   : > { %v268_v17 = vmul.f32 %v1462_v15, %v266_v16 }
 0x15d   : > { %270 = vrot.lane.b32.xlu1 %v268_v17, %s1532_s23 }
 0x15e   : > { %v261_v18 = vpop.permute.xlu0 %260 }
 0x15f   : > { %v263_v19 = vmul.f32 %v1462_v15, %v261_v18 }
 0x1cf   : > { %v271_v20 = vpop.permute.xlu1 %270 }
 0x1d0   : > { %v273_v21 = vadd.f32 %v271_v20, %v263_v19 }
 0x1d2   : > { %1463 = vtanh.f32 %v273_v21 }
 0x1df   : > { %v1464_v22 = vpop.eup %1463 }
 0x1e0   : > { %276 = vrot.lane.b32.xlu1 %v1464_v22, %s1531_s22 }
 0x1e4   : > { %286 = vrot.lane.b32.xlu1 %v273_v21, %s1533_s24 }
 0x252   : > { %v277_v23 = vpop.permute.xlu1 %276 }
 0x253   : > { %v279_v24 = vmul.f32 %v1462_v15, %v277_v23 }
 0x255   : > { %281 = vrot.lane.b32.xlu0 %v279_v24, %s1532_s23 }
 0x256   : > { %v287_v25 = vpop.permute.xlu1 %286 }
 0x257   : > { %289 = vst.msk [vmem:[#allocation3] sm:$0x3] %vm164_vm0, %v287_v25 }
 0x25e   : > { %v379_v26 = vld [vmem:[#allocation3] sm:$0x3] }
 0x25f   : > { %381 = vrot.lane.b32.xlu1 %v379_v26, %s1532_s23 }
 0x2c7   : > { %v282_v27 = vpop.permute.xlu0 %281 }
 0x2c8   : > { %284 = vst.msk [vmem:[#allocation2] sm:$0x3] %vm164_vm0, %v282_v27  ;;  %291 = vst.msk [vmem:[%s290_s28] sm:$0x3] %vm164_vm0, %v282_v27  ;;  %s1222_s28 = scalar_lea.vmem %s1619_s20, %s1305_s26  ;;  %s1226_s20 = scalar_lea.vmem %s1637_s27, %s1305_s26 }
 0x2cf   : > { %v297_v28 = vld [vmem:[#allocation2] sm:$0x3] }
 0x2d0   : > { %1376 = vmatmul.mubr.msk.f32.vlgmr.msra.gmra.mxu1 %vm176_vm2, %v297_v28 }
 0x2d1   : > { %1390 = vmatpush3.msra.mxu1 %v1577_v1  ;;  %1397 = vmatprep.mubr.msk.f32.mxu1 %vm1530_vm1, %v1529_v0  ;;  %v382_v40 = vpop.permute.xlu1 %381 }
 0x2d2   : > { %1391 = vmatprep.subr.mxu1 %v1529_v0 }
 0x2d3   : > { %1392 = vmatpush3.msra.mxu1 %v1579_v2 }
 0x2d4   : > { %1393 = vmatprep.subr.mxu1 %v1529_v0 }
 0x2d5   : > { %1394 = vmatpush3.msra.mxu1 %v1584_v3 }
 0x2d6   : > { %1395 = vmatprep.subr.mxu1 %v1529_v0 }
 0x2d7   : > { %1396 = vmatpush3.msra.mxu1 %v1590_v4 }
 0x2d8   : > { %1411 = vmatprep.subr.mxu1 %v1529_v0 }
 0x390   : > { %v367_v30 = vpop.f32.mrf.mxu1 }
 0x391   : > { %v371_v31 = vadd.f32 %v1273_v29, %v367_v30 }
 0x392   : > { %v1377_v32 = vpop.f32.mrf.mxu1 }
 0x393   : > { %1465 = vtanh.f32 %v371_v31  ;;  %v1275_v34 = vmul.f32 -1.442695, %v371_v31 }
 0x395   : > { %1467 = vpow2.f32 %v1275_v34 }
 0x3a0   : > { %v1466_v33 = vpop.eup %1465 }
 0x3a1   : > { %386 = vrot.lane.b32.xlu0 %v1466_v33, %s1531_s22 }
 0x3a2   : > { %v1468_v35 = vpop.eup %1467 }
 0x3a3   : > { %v375_v36 = vadd.f32 1.0, %v1468_v35 }
 0x3a5   : > { %1469 = vrcp.f32 %v375_v36  ;;  %v657_v36 = vld [vmem:[%s656_s14] sm:$0x3] }
 0x3b2   : > { %v1470_v37 = vpop.eup %1469 }
 0x3b3   : > { %v384_v41 = vmul.f32 %v1470_v37, %v382_v40 }
 0x413   : > { %v387_v38 = vpop.permute.xlu0 %386 }
 0x414   : > { %v389_v39 = vmul.f32 %v1470_v37, %v387_v38 }
 0x416   : > { %391 = vrot.lane.b32.xlu0 %v389_v39, %s1532_s23 }
 0x488   : > { %v392_v42 = vpop.permute.xlu0 %391 }
 0x489   : > { %v394_v43 = vadd.f32 %v392_v42, %v384_v41 }
 0x48b   : > { %1471 = vtanh.f32 %v394_v43 }
 0x498   : > { %v1472_v44 = vpop.eup %1471 }
 0x499   : > { %397 = vrot.lane.b32.xlu1 %v1472_v44, %s1531_s22 }
 0x49d   : > { %407 = vrot.lane.b32.xlu1 %v394_v43, %s1533_s24 }
 0x50b   : > { %v398_v45 = vpop.permute.xlu1 %397 }
 0x50c   : > { %v400_v46 = vmul.f32 %v1470_v37, %v398_v45 }
 0x50e   : > { %402 = vrot.lane.b32.xlu0 %v400_v46, %s1532_s23 }
 0x50f   : > { %v408_v47 = vpop.permute.xlu1 %407 }
 0x510   : > { %410 = vst.msk [vmem:[#allocation3] sm:$0x3] %vm164_vm0, %v408_v47 }
 0x517   : > { %v500_v48 = vld [vmem:[#allocation3] sm:$0x3] }
 0x518   : > { %502 = vrot.lane.b32.xlu1 %v500_v48, %s1532_s23 }
 0x580   : > { %v403_v49 = vpop.permute.xlu0 %402 }
 0x581   : > { %405 = vst.msk [vmem:[#allocation2] sm:$0x3] %vm164_vm0, %v403_v49  ;;  %1277 = vst.msk [vmem:[%s1184_s3 + $0x2] sm:$0x3] %vm164_vm0, %v403_v49 }
 0x588   : > { %v418_v50 = vld [vmem:[#allocation2] sm:$0x3] }
 0x589   : > { %1387 = vmatmul.mubr.msk.f32.vlgmr.msra.gmra.mxu0 %vm176_vm2, %v418_v50 }
 0x58a   : > { %1401 = vmatpush3.msra.mxu0 %v1577_v1  ;;  %1408 = vmatprep.mubr.msk.f32.mxu0 %vm1530_vm1, %v1529_v0  ;;  %v503_v62 = vpop.permute.xlu1 %502 }
 0x58b   : > { %1402 = vmatprep.subr.mxu0 %v1529_v0 }
 0x58c   : > { %1403 = vmatpush3.msra.mxu0 %v1579_v2 }
 0x58d   : > { %1404 = vmatprep.subr.mxu0 %v1529_v0 }
 0x58e   : > { %1405 = vmatpush3.msra.mxu0 %v1584_v3 }
 0x58f   : > { %1406 = vmatprep.subr.mxu0 %v1529_v0 }
 0x590   : > { %1407 = vmatpush3.msra.mxu0 %v1590_v4 }
 0x591   : > { %1422 = vmatprep.subr.mxu0 %v1529_v0 }
 0x649   : > { %v488_v52 = vpop.f32.mrf.mxu0 }
 0x64a   : > { %v492_v53 = vadd.f32 %v1279_v51, %v488_v52 }
 0x64b   : > { %v1388_v54 = vpop.f32.mrf.mxu0 }
 0x64c   : > { %1473 = vtanh.f32 %v492_v53  ;;  %v1281_v56 = vmul.f32 -1.442695, %v492_v53 }
 0x64e   : > { %1475 = vpow2.f32 %v1281_v56 }
 0x659   : > { %v1474_v55 = vpop.eup %1473 }
 0x65a   : > { %507 = vrot.lane.b32.xlu0 %v1474_v55, %s1531_s22 }
 0x65b   : > { %v1476_v57 = vpop.eup %1475 }
 0x65c   : > { %v496_v58 = vadd.f32 1.0, %v1476_v57 }
 0x65e   : > { %1477 = vrcp.f32 %v496_v58  ;;  %v1294_v58 = vld [vmem:[%s1206_s17 + $0xa] sm:$0x3] }
 0x66b   : > { %v1478_v59 = vpop.eup %1477 }
 0x66c   : > { %v505_v63 = vmul.f32 %v1478_v59, %v503_v62 }
 0x6cc   : > { %v508_v60 = vpop.permute.xlu0 %507 }
 0x6cd   : > { %v510_v61 = vmul.f32 %v1478_v59, %v508_v60 }
 0x6cf   : > { %512 = vrot.lane.b32.xlu0 %v510_v61, %s1532_s23 }
 0x741   : > { %v513_v5 = vpop.permute.xlu0 %512 }
 0x742   : > { %v515_v6 = vadd.f32 %v513_v5, %v505_v63 }
 0x744   : > { %1479 = vtanh.f32 %v515_v6 }
 0x751   : > { %v1480_v7 = vpop.eup %1479 }
 0x752   : > { %518 = vrot.lane.b32.xlu1 %v1480_v7, %s1531_s22 }
 0x756   : > { %528 = vrot.lane.b32.xlu1 %v515_v6, %s1533_s24 }
 0x7c4   : > { %v519_v8 = vpop.permute.xlu1 %518 }
 0x7c5   : > { %v521_v9 = vmul.f32 %v1478_v59, %v519_v8 }
 0x7c7   : > { %523 = vrot.lane.b32.xlu0 %v521_v9, %s1532_s23 }
 0x7c8   : > { %v529_v10 = vpop.permute.xlu1 %528 }
 0x7c9   : > { %531 = vst.msk [vmem:[#allocation3] sm:$0x3] %vm164_vm0, %v529_v10 }
 0x7d0   : > { %v620_v11 = vld [vmem:[#allocation3] sm:$0x3] }
 0x7d1   : > { %622 = vrot.lane.b32.xlu1 %v620_v11, %s1532_s23 }
 0x839   : > { %v524_v12 = vpop.permute.xlu0 %523 }
 0x83a   : > { %526 = vst.msk [vmem:[#allocation2] sm:$0x3] %vm164_vm0, %v524_v12  ;;  %1283 = vst.msk [vmem:[%s1192_s6 + $0x4] sm:$0x3] %vm164_vm0, %v524_v12 }
 0x841   : > { %v538_v13 = vld [vmem:[#allocation2] sm:$0x3] }
 0x842   : > { %1398 = vmatmul.mubr.msk.f32.vlgmr.msra.gmra.mxu1 %vm176_vm2, %v538_v13 }
 0x843   : > { %1412 = vmatpush3.msra.mxu1 %v1577_v1  ;;  %1419 = vmatprep.mubr.msk.f32.mxu1 %vm1530_vm1, %v1529_v0  ;;  %v623_v25 = vpop.permute.xlu1 %622 }
 0x844   : > { %1413 = vmatprep.subr.mxu1 %v1529_v0 }
 0x845   : > { %1414 = vmatpush3.msra.mxu1 %v1579_v2 }
 0x846   : > { %1415 = vmatprep.subr.mxu1 %v1529_v0 }
 0x847   : > { %1416 = vmatpush3.msra.mxu1 %v1584_v3 }
 0x848   : > { %1417 = vmatprep.subr.mxu1 %v1529_v0 }
 0x849   : > { %1418 = vmatpush3.msra.mxu1 %v1590_v4 }
 0x84a   : > { %1433 = vmatprep.subr.mxu1 %v1529_v0 }
 0x902   : > { %v608_v15 = vpop.f32.mrf.mxu1 }
 0x903   : > { %v612_v16 = vadd.f32 %v1285_v14, %v608_v15 }
 0x904   : > { %v1399_v17 = vpop.f32.mrf.mxu1 }
 0x905   : > { %1481 = vtanh.f32 %v612_v16  ;;  %v1287_v19 = vmul.f32 -1.442695, %v612_v16  ;;  %v1300_v16 = vld [vmem:[%s1214_s21 + $0xc] sm:$0x3] }
 0x907   : > { %1483 = vpow2.f32 %v1287_v19 }
 0x912   : > { %v1482_v18 = vpop.eup %1481 }
 0x913   : > { %627 = vrot.lane.b32.xlu0 %v1482_v18, %s1531_s22 }
 0x914   : > { %v1484_v20 = vpop.eup %1483 }
 0x915   : > { %v616_v21 = vadd.f32 1.0, %v1484_v20 }
 0x917   : > { %1485 = vrcp.f32 %v616_v21 }
 0x924   : > { %v1486_v22 = vpop.eup %1485 }
 0x925   : > { %v625_v26 = vmul.f32 %v1486_v22, %v623_v25 }
 0x985   : > { %v628_v23 = vpop.permute.xlu0 %627 }
 0x986   : > { %v630_v24 = vmul.f32 %v1486_v22, %v628_v23 }
 0x988   : > { %632 = vrot.lane.b32.xlu0 %v630_v24, %s1532_s23 }
 0x9fa   : > { %v633_v27 = vpop.permute.xlu0 %632 }
 0x9fb   : > { %v635_v28 = vadd.f32 %v633_v27, %v625_v26 }
 0x9fd   : > { %1487 = vtanh.f32 %v635_v28 }
 0xa0a   : > { %v1488_v29 = vpop.eup %1487 }
 0xa0b   : > { %638 = vrot.lane.b32.xlu1 %v1488_v29, %s1531_s22 }
 0xa0f   : > { %648 = vrot.lane.b32.xlu1 %v635_v28, %s1533_s24 }
 0xa7d   : > { %v639_v30 = vpop.permute.xlu1 %638 }
 0xa7e   : > { %v641_v31 = vmul.f32 %v1486_v22, %v639_v30 }
 0xa80   : > { %643 = vrot.lane.b32.xlu0 %v641_v31, %s1532_s23 }
 0xa81   : > { %v649_v32 = vpop.permute.xlu1 %648 }
 0xa82   : > { %651 = vst.msk [vmem:[#allocation3] sm:$0x3] %vm164_vm0, %v649_v32 }
 0xa89   : > { %v740_v33 = vld [vmem:[#allocation3] sm:$0x3] }
 0xa8a   : > { %742 = vrot.lane.b32.xlu1 %v740_v33, %s1532_s23 }
 0xaf2   : > { %v644_v34 = vpop.permute.xlu0 %643 }
 0xaf3   : > { %646 = vst.msk [vmem:[#allocation2] sm:$0x3] %vm164_vm0, %v644_v34  ;;  %1289 = vst.msk [vmem:[%s1198_s11 + $0x6] sm:$0x3] %vm164_vm0, %v644_v34 }
 0xafa   : > { %v658_v35 = vld [vmem:[#allocation2] sm:$0x3] }
 0xafb   : > { %1409 = vmatmul.mubr.msk.f32.vlgmr.msra.gmra.mxu0 %vm176_vm2, %v658_v35 }
 0xafc   : > { %1423 = vmatpush3.msra.mxu0 %v1577_v1  ;;  %1430 = vmatprep.mubr.msk.f32.mxu0 %vm1530_vm1, %v1529_v0  ;;  %v743_v47 = vpop.permute.xlu1 %742 }
 0xafd   : > { %1424 = vmatprep.subr.mxu0 %v1529_v0 }
 0xafe   : > { %1425 = vmatpush3.msra.mxu0 %v1579_v2 }
 0xaff   : > { %1426 = vmatprep.subr.mxu0 %v1529_v0 }
 0xb00   : > { %1427 = vmatpush3.msra.mxu0 %v1584_v3 }
 0xb01   : > { %1428 = vmatprep.subr.mxu0 %v1529_v0 }
 0xb02   : > { %1429 = vmatpush3.msra.mxu0 %v1590_v4 }
 0xbbb   : > { %v728_v37 = vpop.f32.mrf.mxu0 }
 0xbbc   : > { %v732_v38 = vadd.f32 %v728_v37, %v657_v36 }
 0xbbd   : > { %v1410_v39 = vpop.f32.mrf.mxu0 }
 0xbbe   : > { %1489 = vtanh.f32 %v732_v38  ;;  %v1292_v41 = vmul.f32 -1.442695, %v732_v38  ;;  %v1306_v38 = vld [vmem:[%s1222_s28 + $0xe] sm:$0x3] }
 0xbc0   : > { %1491 = vpow2.f32 %v1292_v41 }
 0xbcb   : > { %v1490_v40 = vpop.eup %1489 }
 0xbcc   : > { %747 = vrot.lane.b32.xlu0 %v1490_v40, %s1531_s22 }
 0xbcd   : > { %v1492_v42 = vpop.eup %1491 }
 0xbce   : > { %v736_v43 = vadd.f32 1.0, %v1492_v42 }
 0xbd0   : > { %1493 = vrcp.f32 %v736_v43 }
 0xbdd   : > { %v1494_v44 = vpop.eup %1493 }
 0xbde   : > { %v745_v48 = vmul.f32 %v1494_v44, %v743_v47 }
 0xc3e   : > { %v748_v45 = vpop.permute.xlu0 %747 }
 0xc3f   : > { %v750_v46 = vmul.f32 %v1494_v44, %v748_v45 }
 0xc41   : > { %752 = vrot.lane.b32.xlu0 %v750_v46, %s1532_s23 }
 0xcb3   : > { %v753_v49 = vpop.permute.xlu0 %752 }
 0xcb4   : > { %v755_v50 = vadd.f32 %v753_v49, %v745_v48 }
 0xcb6   : > { %1495 = vtanh.f32 %v755_v50 }
 0xcc3   : > { %v1496_v51 = vpop.eup %1495 }
 0xcc4   : > { %758 = vrot.lane.b32.xlu1 %v1496_v51, %s1531_s22 }
 0xcc8   : > { %768 = vrot.lane.b32.xlu1 %v755_v50, %s1533_s24 }
 0xd36   : > { %v759_v52 = vpop.permute.xlu1 %758 }
 0xd37   : > { %v761_v53 = vmul.f32 %v1494_v44, %v759_v52 }
 0xd39   : > { %763 = vrot.lane.b32.xlu0 %v761_v53, %s1532_s23 }
 0xd3a   : > { %v769_v54 = vpop.permute.xlu1 %768 }
 0xd3b   : > { %771 = vst.msk [vmem:[#allocation3] sm:$0x3] %vm164_vm0, %v769_v54 }
 0xd42   : > { %v861_v55 = vld [vmem:[#allocation3] sm:$0x3] }
 0xd43   : > { %863 = vrot.lane.b32.xlu1 %v861_v55, %s1532_s23 }
 0xdab   : > { %v764_v56 = vpop.permute.xlu0 %763 }
 0xdac   : > { %766 = vst.msk [vmem:[#allocation2] sm:$0x3] %vm164_vm0, %v764_v56  ;;  %773 = vst.msk [vmem:[%s772_s15] sm:$0x3] %vm164_vm0, %v764_v56 }
 0xdb3   : > { %v779_v57 = vld [vmem:[#allocation2] sm:$0x3] }
 0xdb4   : > { %1420 = vmatmul.mubr.msk.f32.vlgmr.msra.gmra.mxu1 %vm176_vm2, %v779_v57 }
 0xdb5   : > { %1434 = vmatpush3.msra.mxu1 %v1577_v1  ;;  %1441 = vmatprep.mubr.msk.f32.mxu1 %vm1530_vm1, %v1529_v0 }
 0xdb6   : > { %1435 = vmatprep.subr.mxu1 %v1529_v0 }
 0xdb7   : > { %1436 = vmatpush3.msra.mxu1 %v1579_v2 }
 0xdb8   : > { %1437 = vmatprep.subr.mxu1 %v1529_v0 }
 0xdb9   : > { %1438 = vmatpush3.msra.mxu1 %v1584_v3 }
 0xdba   : > { %1439 = vmatprep.subr.mxu1 %v1529_v0 }
 0xdbb   : > { %1440 = vmatpush3.msra.mxu1 %v1590_v4  ;;  %v864_v4 = vpop.permute.xlu1 %863 }
 0xe74   : > { %v849_v1 = vpop.f32.mrf.mxu1 }
 0xe75   : > { %v853_v59 = vadd.f32 %v1294_v58, %v849_v1 }
 0xe76   : > { %v1421_v60 = vpop.f32.mrf.mxu1 }
 0xe77   : > { %1497 = vtanh.f32 %v853_v59  ;;  %v1296_v2 = vmul.f32 -1.442695, %v853_v59 }
 0xe79   : > { %1499 = vpow2.f32 %v1296_v2 }
 0xe84   : > { %v1498_v61 = vpop.eup %1497 }
 0xe85   : > { %868 = vrot.lane.b32.xlu0 %v1498_v61, %s1531_s22 }
 0xe86   : > { %v1500_v62 = vpop.eup %1499 }
 0xe87   : > { %v857_v63 = vadd.f32 1.0, %v1500_v62 }
 0xe89   : > { %1501 = vrcp.f32 %v857_v63 }
 0xe96   : > { %v1502_v3 = vpop.eup %1501 }
 0xe97   : > { %v866_v6 = vmul.f32 %v1502_v3, %v864_v4 }
 0xef7   : > { %v869_v0 = vpop.permute.xlu0 %868 }
 0xef8   : > { %v871_v5 = vmul.f32 %v1502_v3, %v869_v0 }
 0xefa   : > { %873 = vrot.lane.b32.xlu0 %v871_v5, %s1532_s23 }
 0xf6c   : > { %v874_v7 = vpop.permute.xlu0 %873 }
 0xf6d   : > { %v876_v8 = vadd.f32 %v874_v7, %v866_v6 }
 0xf6f   : > { %1503 = vtanh.f32 %v876_v8 }
 0xf7c   : > { %v1504_v9 = vpop.eup %1503 }
 0xf7d   : > { %879 = vrot.lane.b32.xlu1 %v1504_v9, %s1531_s22 }
 0xf81   : > { %889 = vrot.lane.b32.xlu1 %v876_v8, %s1533_s24 }
 0xfef   : > { %v880_v10 = vpop.permute.xlu1 %879 }
 0xff0   : > { %v882_v11 = vmul.f32 %v1502_v3, %v880_v10 }
 0xff2   : > { %884 = vrot.lane.b32.xlu0 %v882_v11, %s1532_s23 }
 0xff3   : > { %v890_v12 = vpop.permute.xlu1 %889 }
 0xff4   : > { %892 = vst.msk [vmem:[#allocation3] sm:$0x3] %vm164_vm0, %v890_v12 }
 0xffb   : > { %v982_v13 = vld [vmem:[#allocation3] sm:$0x3] }
 0xffc   : > { %984 = vrot.lane.b32.xlu1 %v982_v13, %s1532_s23 }
0x1064   : > { %v885_v14 = vpop.permute.xlu0 %884 }
0x1065   : > { %887 = vst.msk [vmem:[#allocation2] sm:$0x3] %vm164_vm0, %v885_v14  ;;  %1298 = vst.msk [vmem:[%s1210_s18 + $0xa] sm:$0x3] %vm164_vm0, %v885_v14 }
0x106c   : > { %v900_v15 = vld [vmem:[#allocation2] sm:$0x3] }
0x106d   : > { %1431 = vmatmul.mubr.msk.f32.vlgmr.msra.gmra.mxu0 %vm176_vm2, %v900_v15 }
0x106e   : > { %v985_v27 = vpop.permute.xlu1 %984 }
0x112d   : > { %v970_v17 = vpop.f32.mrf.mxu0 }
0x112e   : > { %v974_v18 = vadd.f32 %v1300_v16, %v970_v17 }
0x112f   : > { %v1432_v19 = vpop.f32.mrf.mxu0 }
0x1130   : > { %1505 = vtanh.f32 %v974_v18  ;;  %v1302_v21 = vmul.f32 -1.442695, %v974_v18 }
0x1132   : > { %1507 = vpow2.f32 %v1302_v21 }
0x113d   : > { %v1506_v20 = vpop.eup %1505 }
0x113e   : > { %989 = vrot.lane.b32.xlu0 %v1506_v20, %s1531_s22 }
0x113f   : > { %v1508_v22 = vpop.eup %1507 }
0x1140   : > { %v978_v23 = vadd.f32 1.0, %v1508_v22 }
0x1142   : > { %1509 = vrcp.f32 %v978_v23 }
0x114f   : > { %v1510_v24 = vpop.eup %1509 }
0x1150   : > { %v987_v28 = vmul.f32 %v1510_v24, %v985_v27 }
0x11b0   : > { %v990_v25 = vpop.permute.xlu0 %989 }
0x11b1   : > { %v992_v26 = vmul.f32 %v1510_v24, %v990_v25 }
0x11b3   : > { %994 = vrot.lane.b32.xlu0 %v992_v26, %s1532_s23 }
0x1225   : > { %v995_v29 = vpop.permute.xlu0 %994 }
0x1226   : > { %v997_v30 = vadd.f32 %v995_v29, %v987_v28 }
0x1228   : > { %1511 = vtanh.f32 %v997_v30 }
0x1235   : > { %v1512_v31 = vpop.eup %1511 }
0x1236   : > { %1000 = vrot.lane.b32.xlu1 %v1512_v31, %s1531_s22 }
0x123a   : > { %1010 = vrot.lane.b32.xlu1 %v997_v30, %s1533_s24 }
0x12a8   : > { %v1001_v32 = vpop.permute.xlu1 %1000 }
0x12a9   : > { %v1003_v33 = vmul.f32 %v1510_v24, %v1001_v32 }
0x12ab   : > { %1005 = vrot.lane.b32.xlu0 %v1003_v33, %s1532_s23 }
0x12ac   : > { %v1011_v34 = vpop.permute.xlu1 %1010 }
0x12ad   : > { %1013 = vst.msk [vmem:[#allocation3] sm:$0x3] %vm164_vm0, %v1011_v34 }
0x12b4   : > { %v1103_v35 = vld [vmem:[#allocation3] sm:$0x3] }
0x12b5   : > { %1105 = vrot.lane.b32.xlu1 %v1103_v35, %s1532_s23 }
0x131d   : > { %v1006_v36 = vpop.permute.xlu0 %1005 }
0x131e   : > { %1008 = vst.msk [vmem:[#allocation2] sm:$0x3] %vm164_vm0, %v1006_v36  ;;  %1304 = vst.msk [vmem:[%s1218_s25 + $0xc] sm:$0x3] %vm164_vm0, %v1006_v36 }
0x1325   : > { %v1021_v37 = vld [vmem:[#allocation2] sm:$0x3] }
0x1326   : > { %1442 = vmatmul.mubr.msk.f32.vlgmr.msra.gmra.mxu1 %vm176_vm2, %v1021_v37 }
0x1327   : > { %v1106_v49 = vpop.permute.xlu1 %1105 }
0x13e6   : > { %v1091_v39 = vpop.f32.mrf.mxu1 }
0x13e7   : > { %v1095_v40 = vadd.f32 %v1306_v38, %v1091_v39 }
0x13e8   : > { %v1443_v41 = vpop.f32.mrf.mxu1 }
0x13e9   : > { %1513 = vtanh.f32 %v1095_v40  ;;  %v1308_v43 = vmul.f32 -1.442695, %v1095_v40 }
0x13eb   : > { %1515 = vpow2.f32 %v1308_v43 }
0x13f6   : > { %v1514_v42 = vpop.eup %1513 }
0x13f7   : > { %1110 = vrot.lane.b32.xlu0 %v1514_v42, %s1531_s22 }
0x13f8   : > { %v1516_v44 = vpop.eup %1515 }
0x13f9   : > { %v1099_v45 = vadd.f32 1.0, %v1516_v44 }
0x13fb   : > { %1517 = vrcp.f32 %v1099_v45 }
0x1408   : > { %v1518_v46 = vpop.eup %1517 }
0x1409   : > { %v1108_v50 = vmul.f32 %v1518_v46, %v1106_v49 }
0x1469   : > { %v1111_v47 = vpop.permute.xlu0 %1110 }
0x146a   : > { %v1113_v48 = vmul.f32 %v1518_v46, %v1111_v47 }
0x146c   : > { %1115 = vrot.lane.b32.xlu0 %v1113_v48, %s1532_s23 }
0x14de   : > { %v1116_v51 = vpop.permute.xlu0 %1115 }
0x14df   : > { %v1118_v52 = vadd.f32 %v1116_v51, %v1108_v50 }
0x14e1   : > { %1519 = vtanh.f32 %v1118_v52 }
0x14ee   : > { %v1520_v53 = vpop.eup %1519 }
0x14ef   : > { %1121 = vrot.lane.b32.xlu1 %v1520_v53, %s1531_s22 }
0x14f3   : > { %1131 = vrot.lane.b32.xlu1 %v1118_v52, %s1533_s24 }
0x1561   : > { %v1122_v54 = vpop.permute.xlu1 %1121 }
0x1562   : > { %v1124_v55 = vmul.f32 %v1518_v46, %v1122_v54 }
0x1564   : > { %1126 = vrot.lane.b32.xlu0 %v1124_v55, %s1532_s23 }
0x1565   : > { %v1132_v56 = vpop.permute.xlu1 %1131 }
0x1566   : > { %1134 = vst.msk [vmem:[#allocation3] sm:$0x3] %vm164_vm0, %v1132_v56 }
0x15d6   : > { %v1127_v57 = vpop.permute.xlu0 %1126 }
0x15d7   : > { %1129 = vst.msk [vmem:[#allocation2] sm:$0x3] %vm164_vm0, %v1127_v57  ;;  %1310 = vst.msk [vmem:[%s1226_s20 + $0xe] sm:$0x3] %vm164_vm0, %v1127_v57 }
0x15d8 PF: > { %s12_s9 = sadd.s32 1, %s1527_s9  }
0x15d9   : > { %p9_p4 = scmp.ge.s32.totalorder %s12_s9, 4  }
0x15db   :  { %11 = sbr.rel (!%p9_p4) target bundleno = 1 (0x1), region = 77 }

</bundles_post_ra>
